<compile_context>
chip_gen: v6e
topology: v6e:2x2x1
jax: 0.10.0
libtpu: 0.0.40
codegen_flags: <defaults>
</compile_context>

<pallas_src>
import numpy as np
import jax
import jax.numpy as jnp
from jax.experimental import pallas as pl
from jax.experimental.pallas import tpu as pltpu

_VMEM_LIMIT = 48 * 1024 * 1024   # explicit scoped-VMEM budget (fits v5e/v6e/v7x)


# ----------------------------------------------------------------------------
# helpers
# ----------------------------------------------------------------------------
def _pad_to(n, m):
    return ((n + m - 1) // m) * m


def _node_tiling(n):
    """(padded node count, node-tile rows). Single tile for small graphs."""
    if n <= 256:
        n_pad = _pad_to(n, 8)
        return n_pad, n_pad
    tm = 256
    return _pad_to(n, tm), tm


def _item_tiling(m):
    """(padded item count, item-tile width) for the tiled logits matmul."""
    if m <= 2048:
        m_pad = _pad_to(m, 8)
        return m_pad, m_pad          # single tile
    tn = 2048
    return _pad_to(m, tn), tn


def _full_spec(shape):
    nd = len(shape)
    return pl.BlockSpec(shape, lambda *_, _n=nd: (0,) * _n)


def _rowtile_spec(shape):
    nd = len(shape)
    return pl.BlockSpec(shape, lambda i, _n=nd: (i,) + (0,) * (_n - 1))


def _mxu(a, b):
    """(M,K)x(K,N) with bf16 operands and f32 accumulation (MXU-friendly)."""
    return jnp.dot(a.astype(jnp.bfloat16), b.astype(jnp.bfloat16),
                   preferred_element_type=jnp.float32)


def _mxu_nt(a, b):
    """(M,K)x(N,K) -> (M,N): contract the last dims (avoids materializing b.T)."""
    return jax.lax.dot_general(a.astype(jnp.bfloat16), b.astype(jnp.bfloat16),
                               (((1,), (1,)), ((), ())),
                               preferred_element_type=jnp.float32)


def _renorm(x):
    """nn.Embedding(max_norm=1): rows with L2 norm > 1 rescaled to unit norm."""
    norm = jnp.sqrt(jnp.sum(x * x, axis=-1, keepdims=True))
    return x * jnp.where(norm > 1.0, 1.0 / (norm + 1e-7), 1.0)


def _bn_affine(x, valid, n_real, gamma, beta, eps=1e-5):
    """Training-mode BatchNorm1d folded into a per-column affine (scale, shift).
    Stats are taken over the n_real valid rows only (padding rows excluded)."""
    xs = x * valid
    mean = jnp.sum(xs, axis=0) / n_real
    var = jnp.sum(((x - mean) ** 2) * valid, axis=0) / n_real
    scale = gamma / jnp.sqrt(var + eps)
    shift = beta - mean * scale
    return (scale.reshape(1, -1).astype(jnp.float32),
            shift.reshape(1, -1).astype(jnp.float32))


# ----------------------------------------------------------------------------
# Kernel 1: EOPA layer
#   fused BN affine + masked GRU reducer + fc_self/fc_neigh + PReLU
#   + fused torch.cat([out, feat], dim=1) output block
# ----------------------------------------------------------------------------
def _eopa_kernel(feat_ref, mbox_ref, deg_ref, scale_ref, shift_ref,
                 wir_ref, wiz_ref, win_ref, whr_ref, whz_ref, whn_ref,
                 bir_ref, biz_ref, bin_ref, bhr_ref, bhz_ref, bhn_ref,
                 wself_ref, wneigh_ref, prelu_ref,
                 o_ref,
                 gir_scr, giz_scr, gin_scr):
    maxdeg, tm, F = mbox_ref.shape
    D = wself_ref.shape[1]
    scale = scale_ref[...]                         # [1, F] fused BatchNorm affine
    shift = shift_ref[...]

    feat = feat_ref[...]                           # [tm, F] raw f32
    fbn = feat * scale + shift

    # BN-affine the (bf16) raw mailbox and stack it time-major into one big LHS.
    x_all = jnp.concatenate(
        [mbox_ref[t].astype(jnp.float32) * scale + shift for t in range(maxdeg)],
        axis=0)                                    # [maxdeg*tm, F]

    # Hoisted GRU input-gate matmuls: one (maxdeg*tm, F) x (F, F) MXU dot per gate.
    gir_scr[...] = _mxu(x_all, wir_ref[...]) + bir_ref[...]
    giz_scr[...] = _mxu(x_all, wiz_ref[...]) + biz_ref[...]
    gin_scr[...] = _mxu(x_all, win_ref[...]) + bin_ref[...]

    deg = deg_ref[...]                             # [tm, 1] int32 in-degree
    whr = whr_ref[...]; whz = whz_ref[...]; whn = whn_ref[...]
    bhr = bhr_ref[...]; bhz = bhz_ref[...]; bhn = bhn_ref[...]

    def step(t, h):
        row = pl.multiple_of(t * tm, 8)
        gi_r = gir_scr[pl.ds(row, tm), :]
        gi_z = giz_scr[pl.ds(row, tm), :]
        gi_n = gin_scr[pl.ds(row, tm), :]
        r = jax.nn.sigmoid(gi_r + _mxu(h, whr) + bhr)
        z = jax.nn.sigmoid(gi_z + _mxu(h, whz) + bhz)
        n = jnp.tanh(gi_n + r * (_mxu(h, whn) + bhn))
        h_new = (1.0 - z) * n + z * h
        return jnp.where(deg > t, h_new, h)        # only nodes with in-degree > t advance

    h = jax.lax.fori_loop(0, maxdeg, step,
                          jnp.zeros((tm, F), jnp.float32), unroll=True)

    rst = _mxu(fbn, wself_ref[...]) + _mxu(h, wneigh_ref[...])
    a = prelu_ref[...]
    # Fused concat: columns [0:D] = PReLU(fc_self + fc_neigh), [D:D+F] = raw feat.
    o_ref[:, 0:D] = jnp.where(rst >= 0.0, rst, a * rst)
    o_ref[:, D:D + F] = feat


def eopa_layer(feat, mbox16, deg2, scale, shift, lp, tm):
    n_pad, F = feat.shape
    maxdeg = mbox16.shape[0]
    D = lp['w_self'].shape[1]
    bf = jnp.bfloat16
    return pl.pallas_call(
        _eopa_kernel,
        grid=(n_pad // tm,),
        in_specs=[
            _rowtile_spec((tm, F)),                                # feat (raw)
            pl.BlockSpec((maxdeg, tm, F), lambda i: (0, i, 0)),    # mailbox (bf16)
            _rowtile_spec((tm, 1)),                                # in-degree
            _full_spec((1, F)), _full_spec((1, F)),                # BN scale/shift
            _full_spec((F, F)), _full_spec((F, F)), _full_spec((F, F)),   # w_i{r,z,n}
            _full_spec((F, F)), _full_spec((F, F)), _full_spec((F, F)),   # w_h{r,z,n}
            _full_spec((1, F)), _full_spec((1, F)), _full_spec((1, F)),   # b_i{r,z,n}
            _full_spec((1, F)), _full_spec((1, F)), _full_spec((1, F)),   # b_h{r,z,n}
            _full_spec((F, D)), _full_spec((F, D)), _full_spec((1, D)),   # self/neigh/prelu
        ],
        out_specs=pl.BlockSpec((tm, D + F), lambda i: (i, 0)),
        out_shape=jax.ShapeDtypeStruct((n_pad, D + F), jnp.float32),
        scratch_shapes=[pltpu.VMEM((maxdeg * tm, F), jnp.float32) for _ in range(3)],
        compiler_params=pltpu.CompilerParams(
            dimension_semantics=("parallel",),
            vmem_limit_bytes=_VMEM_LIMIT),
    )(feat, mbox16, deg2, scale, shift,
      lp['w_ir'].astype(bf), lp['w_iz'].astype(bf), lp['w_in'].astype(bf),
      lp['w_hr'].astype(bf), lp['w_hz'].astype(bf), lp['w_hn'].astype(bf),
      lp['b_ir'], lp['b_iz'], lp['b_in'], lp['b_hr'], lp['b_hz'], lp['b_hn'],
      lp['w_self'].astype(bf), lp['w_neigh'].astype(bf), lp['prelu'])


# ----------------------------------------------------------------------------
# Kernel 2: AttnReadout (fused BN affine, attention, segment softmax, fc_out, PReLU)
# ----------------------------------------------------------------------------
def _readout_kernel(feat_ref, lastraw_ref, mask_ref, memt_ref, scale_ref, shift_ref,
                    wu_ref, wv_ref, bv_ref, we_ref, wout_ref, prelu_ref, o_ref):
    scale = scale_ref[...]
    shift = shift_ref[...]
    feat_bn = feat_ref[...] * scale + shift              # [N, F] fused BatchNorm
    last_bn = lastraw_ref[...] * scale + shift           # [B, F]

    feat_u = _mxu(feat_bn, wu_ref[...])                  # [N, H]
    feat_v = _mxu(last_bn, wv_ref[...]) + bv_ref[...]    # [B, H]
    # dgl.broadcast_nodes: each node gets its graph's feat_v (0/1 membership matmul)
    fv_nodes = _mxu(memt_ref[...], feat_v)               # [N, H]
    s = jax.nn.sigmoid(feat_u + fv_nodes)
    e_row = _mxu_nt(we_ref[...], s)                      # [1, N]  (fc_e)

    mask = mask_ref[...]                                 # [B, N] graph membership
    e_m = jnp.where(mask > 0.5, e_row, jnp.float32(-1e30))
    m = jnp.max(e_m, axis=1, keepdims=True)
    ex = jnp.exp(e_m - m) * mask
    den = jnp.maximum(jnp.sum(ex, axis=1, keepdims=True), jnp.float32(1e-30))
    # NOTE: approx=True is the production choice (EUP vrcp); exact reciprocal kept
    # here so the f32 reference comparison stays tight through the B=2 BatchNorm.
    beta = ex * pl.reciprocal(den, approx=False)         # NaN-safe segment softmax

    rst = _mxu(beta, feat_bn)                            # weighted segment sum [B, F]
    outg = _mxu(rst, wout_ref[...])                      # fc_out [B, D]
    a = prelu_ref[...]
    o_ref[...] = jnp.where(outg >= 0.0, outg, a * outg)  # PReLU


def attn_readout(feat, last_raw, mask, memt, scale, shift, rp):
    n_pad, F = feat.shape
    B = mask.shape[0]
    H = rp['w_u'].shape[1]
    D = rp['w_out'].shape[1]
    bf = jnp.bfloat16
    return pl.pallas_call(
        _readout_kernel,
        grid=(1,),
        in_specs=[_full_spec((n_pad, F)), _full_spec((B, F)),
                  _full_spec((B, n_pad)), _full_spec((n_pad, B)),
                  _full_spec((1, F)), _full_spec((1, F)),
                  _full_spec((F, H)), _full_spec((F, H)), _full_spec((1, H)),
                  _full_spec((1, H)), _full_spec((F, D)), _full_spec((1, D))],
        out_specs=_full_spec((B, D)),
        out_shape=jax.ShapeDtypeStruct((B, D), jnp.float32),
        compiler_params=pltpu.CompilerParams(vmem_limit_bytes=_VMEM_LIMIT),
    )(feat, last_raw, mask, memt, scale, shift,
      rp['w_u'].astype(bf), rp['w_v'].astype(bf), rp['b_v'], rp['w_e'].astype(bf),
      rp['w_out'].astype(bf), rp['prelu'])


# ----------------------------------------------------------------------------
# Kernel 3: fused final BatchNorm + fc_sr
# ----------------------------------------------------------------------------
def _fc_sr_kernel(sr_ref, scale_ref, shift_ref, w_ref, o_ref):
    srbn = sr_ref[...] * scale_ref[...] + shift_ref[...]
    o_ref[...] = _mxu(srbn, w_ref[...])


def fc_sr(sr, scale, shift, w):
    B, F = sr.shape
    D = w.shape[1]
    return pl.pallas_call(
        _fc_sr_kernel,
        grid=(1,),
        in_specs=[_full_spec((B, F)), _full_spec((1, F)), _full_spec((1, F)),
                  _full_spec((F, D))],
        out_specs=_full_spec((B, D)),
        out_shape=jax.ShapeDtypeStruct((B, D), jnp.float32),
        compiler_params=pltpu.CompilerParams(vmem_limit_bytes=_VMEM_LIMIT),
    )(sr, scale, shift, w.astype(jnp.bfloat16))


# ----------------------------------------------------------------------------
# Kernel 4: logits = sr @ renorm(E)^T, tiled over the item dimension.
#   The max_norm=1 row renorm and the bf16 cast are fused in-kernel, so the raw
#   f32 embedding table is streamed from HBM exactly once (no renormalized /
#   bf16 copies are materialized).  Lane-dense [B, tn] output blocks.
# ----------------------------------------------------------------------------
def _logits_kernel(sr_ref, emb_ref, o_ref):
    e = emb_ref[...]                                      # [tn, D] raw f32
    norm = jnp.sqrt(jnp.sum(e * e, axis=1, keepdims=True))
    e_r = e * jnp.where(norm > 1.0, 1.0 / (norm + 1e-7), 1.0)
    # contract on the embedding dim of the [tn, D] table tile (no E^T in HBM)
    o_ref[...] = _mxu_nt(sr_ref[...], e_r)


def logits_matmul(sr, emb_p, tn):
    B, D = sr.shape
    m_pad = emb_p.shape[0]
    return pl.pallas_call(
        _logits_kernel,
        grid=(m_pad // tn,),
        in_specs=[_full_spec((B, D)),
                  pl.BlockSpec((tn, D), lambda j: (j, 0))],
        out_specs=pl.BlockSpec((B, tn), lambda j: (0, j)),
        out_shape=jax.ShapeDtypeStruct((B, m_pad), jnp.float32),
        compiler_params=pltpu.CompilerParams(
            dimension_semantics=("parallel",),
            vmem_limit_bytes=_VMEM_LIMIT),
    )(sr, emb_p)


# ----------------------------------------------------------------------------
# full forward (glue + kernels)
# ----------------------------------------------------------------------------
def lessr_forward(params, graph):
    iid, last_nodes = graph['iid'], graph['last_nodes']
    mask, mbox_src, deg = graph['mask'], graph['mbox_src'], graph['deg']
    N = iid.shape[0]
    B = mask.shape[0]

    emb = params['embedding']
    # nn.Embedding(max_norm=1): renormalize only the looked-up rows here; the
    # full-table renorm for the logits matmul happens inside the logits kernel.
    feat_nodes = _renorm(emb[iid])                                 # [N, D]

    n_pad, tm = _node_tiling(N)
    pad = n_pad - N
    feat = jnp.pad(feat_nodes, ((0, pad), (0, 0)))                 # [n_pad, D]
    deg2 = jnp.pad(deg, (0, pad)).reshape(n_pad, 1)
    mboxs = jnp.pad(mbox_src, ((0, 0), (0, pad)))
    maskp = jnp.pad(mask, ((0, 0), (0, pad)))
    valid = jnp.pad(jnp.ones((N, 1), jnp.float32), ((0, pad), (0, 0)))

    for lp in params['layers']:
        scale, shift = _bn_affine(feat, valid, N, lp['bn_gamma'], lp['bn_beta'])
        # bf16 mailbox gather of *raw* features (BN affine is applied in-kernel).
        # TODO(synk): replace this glue gather with an in-kernel DMA gather
        # (PrefetchScalarGridSpec + pltpu.make_async_copy) so the [maxdeg, N, F]
        # mailbox is never materialized in HBM.
        mbox16 = feat.astype(jnp.bfloat16)[mboxs]                  # [maxdeg, n_pad, F]
        # Kernel output is already torch.cat([out, feat], dim=1).
        feat = eopa_layer(feat, mbox16, deg2, scale, shift, lp, tm)

    rp = params['readout']
    scale, shift = _bn_affine(feat, valid, N, rp['bn_gamma'], rp['bn_beta'])
    last_raw = feat[last_nodes]                                    # [B, F]
    sr_g = attn_readout(feat, last_raw, maskp, maskp.T, scale, shift, rp)
    sr = jnp.concatenate([last_raw, sr_g], axis=1)                 # [B, F + D]

    scale, shift = _bn_affine(sr, jnp.ones((B, 1), jnp.float32), B,
                              params['bn_gamma'], params['bn_beta'])
    sr_out = fc_sr(sr, scale, shift, params['fc_sr_w'])            # [B, D]

    M = emb.shape[0]
    m_pad, tn = _item_tiling(M)
    emb_p = emb if m_pad == M else jnp.pad(emb, ((0, m_pad - M), (0, 0)))
    logits = logits_matmul(sr_out, emb_p, tn)
    if m_pad != M:
        logits = logits[:, :M]
    return sr_out, logits


# pure-JAX reference (same math / same bf16 casts, no Pallas) for a sanity check
def lessr_forward_ref(params, graph):
    iid, last_nodes = graph['iid'], graph['last_nodes']
    mask, mbox_src, deg = graph['mask'], graph['mbox_src'], graph['deg']
    emb_r = _renorm(params['embedding'])
    feat = emb_r[iid]
    N = feat.shape[0]
    B = mask.shape[0]
    ones_n = jnp.ones((N, 1), jnp.float32)
    deg2 = deg.reshape(N, 1)
    for lp in params['layers']:
        scale, shift = _bn_affine(feat, ones_n, N, lp['bn_gamma'], lp['bn_beta'])
        fbn = feat * scale + shift
        mbox = feat.astype(jnp.bfloat16)[mbox_src].astype(jnp.float32) * scale + shift
        h = jnp.zeros_like(fbn)
        for t in range(mbox.shape[0]):
            x = mbox[t]
            r = jax.nn.sigmoid(_mxu(x, lp['w_ir']) + lp['b_ir'] +
                               _mxu(h, lp['w_hr']) + lp['b_hr'])
            z = jax.nn.sigmoid(_mxu(x, lp['w_iz']) + lp['b_iz'] +
                               _mxu(h, lp['w_hz']) + lp['b_hz'])
            n = jnp.tanh(_mxu(x, lp['w_in']) + lp['b_in'] +
                         r * (_mxu(h, lp['w_hn']) + lp['b_hn']))
            h = jnp.where(deg2 > t, (1.0 - z) * n + z * h, h)
        rst = _mxu(fbn, lp['w_self']) + _mxu(h, lp['w_neigh'])
        out = jnp.where(rst >= 0.0, rst, lp['prelu'] * rst)
        feat = jnp.concatenate([out, feat], axis=1)
    rp = params['readout']
    scale, shift = _bn_affine(feat, ones_n, N, rp['bn_gamma'], rp['bn_beta'])
    fbn = feat * scale + shift
    last_raw = feat[last_nodes]
    lbn = last_raw * scale + shift
    s = jax.nn.sigmoid(_mxu(fbn, rp['w_u']) +
                       _mxu(mask.T, _mxu(lbn, rp['w_v']) + rp['b_v']))
    e_row = _mxu_nt(rp['w_e'], s)
    e_m = jnp.where(mask > 0.5, e_row, -1e30)
    ex = jnp.exp(e_m - jnp.max(e_m, axis=1, keepdims=True)) * mask
    den = jnp.maximum(jnp.sum(ex, axis=1, keepdims=True), 1e-30)
    beta = ex * (1.0 / den)
    outg = _mxu(_mxu(beta, fbn), rp['w_out'])
    sr_g = jnp.where(outg >= 0.0, outg, rp['prelu'] * outg)
    sr = jnp.concatenate([last_raw, sr_g], axis=1)
    scale, shift = _bn_affine(sr, jnp.ones((B, 1), jnp.float32), B,
                              params['bn_gamma'], params['bn_beta'])
    sr_out = _mxu(sr * scale + shift, params['fc_sr_w'])
    logits = _mxu_nt(sr_out, emb_r)
    return sr_out, logits


# ----------------------------------------------------------------------------
# deterministic parameter init (matches the module's shapes; GRU gates split r/z/n)
# ----------------------------------------------------------------------------
def init_params(key, num_items, D, num_layers):
    keys = iter(jax.random.split(key, 64))

    def nrm(shape, scl=0.1):
        return scl * jax.random.normal(next(keys), shape, dtype=jnp.float32)

    params = {'embedding': jax.random.normal(next(keys), (num_items, D), dtype=jnp.float32)}
    layers, in_dim = [], D
    for _ in range(num_layers):
        lp = {'bn_gamma': jnp.ones((in_dim,), jnp.float32),
              'bn_beta': jnp.zeros((in_dim,), jnp.float32)}
        for g in ('r', 'z', 'n'):
            lp['w_i' + g] = nrm((in_dim, in_dim))      # GRU W_i{g}^T
            lp['w_h' + g] = nrm((in_dim, in_dim))      # GRU W_h{g}^T
            lp['b_i' + g] = nrm((1, in_dim))
            lp['b_h' + g] = nrm((1, in_dim))
        lp['w_self'] = nrm((in_dim, D))
        lp['w_neigh'] = nrm((in_dim, D))
        lp['prelu'] = jnp.full((1, D), 0.25, jnp.float32)
        layers.append(lp)
        in_dim += D
    params['layers'] = layers
    params['readout'] = {
        'bn_gamma': jnp.ones((in_dim,), jnp.float32),
        'bn_beta': jnp.zeros((in_dim,), jnp.float32),
        'w_u': nrm((in_dim, D)),
        'w_v': nrm((in_dim, D)),
        'b_v': nrm((1, D)),
        'w_e': nrm((1, D)),
        'w_out': nrm((in_dim, D)),
        'prelu': jnp.full((1, D), 0.25, jnp.float32),
    }
    in_dim += D
    params['bn_gamma'] = jnp.ones((in_dim,), jnp.float32)
    params['bn_beta'] = jnp.zeros((in_dim,), jnp.float32)
    params['fc_sr_w'] = nrm((in_dim, D))
    return params


# ----------------------------------------------------------------------------
if __name__ == "__main__":
    num_items, D, num_layers = 512, 32, 2
    params = init_params(jax.random.PRNGKey(0), num_items, D, num_layers)

    # Batched session graph: B=2 graphs over N=8 nodes.
    # graph 0: nodes 0..4, edges 0->1, 1->2, 2->3, 3->4, 0->3 ; last node = 4
    # graph 1: nodes 5..7, edges 5->6, 6->7                   ; last node = 7
    graph = {
        'iid': jnp.array([3, 7, 3, 12, 5, 20, 20, 9], dtype=jnp.int32),
        'last_nodes': jnp.array([4, 7], dtype=jnp.int32),
        'deg': jnp.array([0, 1, 1, 2, 1, 0, 1, 1], dtype=jnp.int32),          # in-degree
        'mbox_src': jnp.array([[0, 0, 1, 2, 3, 0, 5, 6],                      # padded,
                               [0, 0, 0, 0, 0, 0, 0, 0]], dtype=jnp.int32),   # time-major
        'mask': jnp.array([[1, 1, 1, 1, 1, 0, 0, 0],
                           [0, 0, 0, 0, 0, 1, 1, 1]], dtype=jnp.float32),     # [B, N]
    }

    sr, logits = lessr_forward(params, graph)
    sr = jax.block_until_ready(sr)
    logits = jax.block_until_ready(logits)

    sr_ref, logits_ref = lessr_forward_ref(params, graph)
    np.testing.assert_allclose(np.asarray(sr), np.asarray(sr_ref), rtol=2e-2, atol=1e-2)
    np.testing.assert_allclose(np.asarray(logits), np.asarray(logits_ref), rtol=2e-2, atol=1e-2)
    assert sr.shape == (2, D) and logits.shape == (2, num_items)
    assert np.all(np.isfinite(np.asarray(logits)))

    print("KERNEL_OK")
</pallas_src>

<mosaic_0001>
module attributes {stable_mosaic.version = 11 : i64} {
  func.func @_eopa_kernel(%arg0: i32, %arg1: memref<8x32xf32, #tpu.memory_space<vmem>>, %arg2: memref<2x8x32xbf16, #tpu.memory_space<vmem>>, %arg3: memref<8x1xi32, #tpu.memory_space<vmem>>, %arg4: memref<1x32xf32, #tpu.memory_space<vmem>>, %arg5: memref<1x32xf32, #tpu.memory_space<vmem>>, %arg6: memref<32x32xbf16, #tpu.memory_space<vmem>>, %arg7: memref<32x32xbf16, #tpu.memory_space<vmem>>, %arg8: memref<32x32xbf16, #tpu.memory_space<vmem>>, %arg9: memref<32x32xbf16, #tpu.memory_space<vmem>>, %arg10: memref<32x32xbf16, #tpu.memory_space<vmem>>, %arg11: memref<32x32xbf16, #tpu.memory_space<vmem>>, %arg12: memref<1x32xf32, #tpu.memory_space<vmem>>, %arg13: memref<1x32xf32, #tpu.memory_space<vmem>>, %arg14: memref<1x32xf32, #tpu.memory_space<vmem>>, %arg15: memref<1x32xf32, #tpu.memory_space<vmem>>, %arg16: memref<1x32xf32, #tpu.memory_space<vmem>>, %arg17: memref<1x32xf32, #tpu.memory_space<vmem>>, %arg18: memref<32x32xbf16, #tpu.memory_space<vmem>>, %arg19: memref<32x32xbf16, #tpu.memory_space<vmem>>, %arg20: memref<1x32xf32, #tpu.memory_space<vmem>>, %arg21: memref<8x64xf32, #tpu.memory_space<vmem>>, %arg22: memref<16x32xf32, #tpu.memory_space<vmem>>, %arg23: memref<16x32xf32, #tpu.memory_space<vmem>>, %arg24: memref<16x32xf32, #tpu.memory_space<vmem>>) attributes {dimension_semantics = [#tpu.dimension_semantics<parallel>], iteration_bounds = array<i64: 1>, scalar_prefetch = 0 : i64, scratch_operands = 3 : i64, tpu.core_type = #tpu.core_type<tc>, window_params = [{transform_indices = @transform_0, window_bounds = array<i64: 8, 32>}, {transform_indices = @transform_1, window_bounds = array<i64: 2, 8, 32>}, {transform_indices = @transform_2, window_bounds = array<i64: 8, 1>}, {pipeline_mode = #tpu.pipeline_mode<synchronous>, transform_indices = @transform_3, window_bounds = array<i64: 1, 32>}, {pipeline_mode = #tpu.pipeline_mode<synchronous>, transform_indices = @transform_4, window_bounds = array<i64: 1, 32>}, {pipeline_mode = #tpu.pipeline_mode<synchronous>, transform_indices = @transform_5, window_bounds = array<i64: 32, 32>}, {pipeline_mode = #tpu.pipeline_mode<synchronous>, transform_indices = @transform_6, window_bounds = array<i64: 32, 32>}, {pipeline_mode = #tpu.pipeline_mode<synchronous>, transform_indices = @transform_7, window_bounds = array<i64: 32, 32>}, {pipeline_mode = #tpu.pipeline_mode<synchronous>, transform_indices = @transform_8, window_bounds = array<i64: 32, 32>}, {pipeline_mode = #tpu.pipeline_mode<synchronous>, transform_indices = @transform_9, window_bounds = array<i64: 32, 32>}, {pipeline_mode = #tpu.pipeline_mode<synchronous>, transform_indices = @transform_10, window_bounds = array<i64: 32, 32>}, {pipeline_mode = #tpu.pipeline_mode<synchronous>, transform_indices = @transform_11, window_bounds = array<i64: 1, 32>}, {pipeline_mode = #tpu.pipeline_mode<synchronous>, transform_indices = @transform_12, window_bounds = array<i64: 1, 32>}, {pipeline_mode = #tpu.pipeline_mode<synchronous>, transform_indices = @transform_13, window_bounds = array<i64: 1, 32>}, {pipeline_mode = #tpu.pipeline_mode<synchronous>, transform_indices = @transform_14, window_bounds = array<i64: 1, 32>}, {pipeline_mode = #tpu.pipeline_mode<synchronous>, transform_indices = @transform_15, window_bounds = array<i64: 1, 32>}, {pipeline_mode = #tpu.pipeline_mode<synchronous>, transform_indices = @transform_16, window_bounds = array<i64: 1, 32>}, {pipeline_mode = #tpu.pipeline_mode<synchronous>, transform_indices = @transform_17, window_bounds = array<i64: 32, 32>}, {pipeline_mode = #tpu.pipeline_mode<synchronous>, transform_indices = @transform_18, window_bounds = array<i64: 32, 32>}, {pipeline_mode = #tpu.pipeline_mode<synchronous>, transform_indices = @transform_19, window_bounds = array<i64: 1, 32>}, {transform_indices = @transform_20, window_bounds = array<i64: 8, 64>}]} {
    %c0 = arith.constant 0 : index
    %c0_0 = arith.constant 0 : index
    %0 = vector.load %arg4[%c0, %c0_0] : memref<1x32xf32, #tpu.memory_space<vmem>>, vector<1x32xf32>
    %c0_1 = arith.constant 0 : index
    %c0_2 = arith.constant 0 : index
    %1 = vector.load %arg5[%c0_1, %c0_2] : memref<1x32xf32, #tpu.memory_space<vmem>>, vector<1x32xf32>
    %c0_3 = arith.constant 0 : index
    %c0_4 = arith.constant 0 : index
    %2 = vector.load %arg1[%c0_3, %c0_4] : memref<8x32xf32, #tpu.memory_space<vmem>>, vector<8x32xf32>
    %3 = vector.broadcast %0 : vector<1x32xf32> to vector<8x32xf32>
    %4 = arith.mulf %2, %3 : vector<8x32xf32>
    %5 = vector.broadcast %1 : vector<1x32xf32> to vector<8x32xf32>
    %6 = arith.addf %4, %5 : vector<8x32xf32>
    %c0_5 = arith.constant 0 : index
    %c0_6 = arith.constant 0 : index
    %c0_7 = arith.constant 0 : index
    %7 = vector.load %arg2[%c0_5, %c0_6, %c0_7] : memref<2x8x32xbf16, #tpu.memory_space<vmem>>, vector<1x8x32xbf16>
    %8 = vector.shape_cast %7 : vector<1x8x32xbf16> to vector<8x32xbf16>
    %9 = arith.extf %8 : vector<8x32xbf16> to vector<8x32xf32>
    %10 = vector.broadcast %0 : vector<1x32xf32> to vector<8x32xf32>
    %11 = arith.mulf %9, %10 : vector<8x32xf32>
    %12 = vector.broadcast %1 : vector<1x32xf32> to vector<8x32xf32>
    %13 = arith.addf %11, %12 : vector<8x32xf32>
    %c1 = arith.constant 1 : index
    %c0_8 = arith.constant 0 : index
    %c0_9 = arith.constant 0 : index
    %14 = vector.load %arg2[%c1, %c0_8, %c0_9] : memref<2x8x32xbf16, #tpu.memory_space<vmem>>, vector<1x8x32xbf16>
    %15 = vector.shape_cast %14 : vector<1x8x32xbf16> to vector<8x32xbf16>
    %16 = arith.extf %15 : vector<8x32xbf16> to vector<8x32xf32>
    %17 = vector.broadcast %0 : vector<1x32xf32> to vector<8x32xf32>
    %18 = arith.mulf %16, %17 : vector<8x32xf32>
    %19 = vector.broadcast %1 : vector<1x32xf32> to vector<8x32xf32>
    %20 = arith.addf %18, %19 : vector<8x32xf32>
    %21 = tpu.concatenate %13, %20 in 0 : vector<8x32xf32>, vector<8x32xf32> -> vector<16x32xf32>
    %c0_10 = arith.constant 0 : index
    %c0_11 = arith.constant 0 : index
    %22 = vector.load %arg6[%c0_10, %c0_11] : memref<32x32xbf16, #tpu.memory_space<vmem>>, vector<32x32xbf16>
    %23 = arith.truncf %21 : vector<16x32xf32> to vector<16x32xbf16>
    %cst = arith.constant dense<0.000000e+00> : vector<16x32xf32>
    %24 = tpu.matmul %23, %22, %cst {dimension_numbers = #tpu.dot_dimension_numbers<[1], [0], [0], [1], [0, 0, 1, 1], [], []>} : vector<16x32xbf16>, vector<32x32xbf16>, vector<16x32xf32> -> vector<16x32xf32>
    %c0_12 = arith.constant 0 : index
    %c0_13 = arith.constant 0 : index
    %25 = vector.load %arg12[%c0_12, %c0_13] : memref<1x32xf32, #tpu.memory_space<vmem>>, vector<1x32xf32>
    %26 = vector.broadcast %25 : vector<1x32xf32> to vector<16x32xf32>
    %27 = arith.addf %24, %26 : vector<16x32xf32>
    %c0_14 = arith.constant 0 : index
    %c0_15 = arith.constant 0 : index
    %28 = vector.load %arg22[%c0_14, %c0_15] : memref<16x32xf32, #tpu.memory_space<vmem>>, vector<16x32xf32>
    tpu.vector_store %arg22[%c0_14, %c0_15], %27 {strides = array<i32>} : memref<16x32xf32, #tpu.memory_space<vmem>>, vector<16x32xf32>,
    %c0_16 = arith.constant 0 : index
    %c0_17 = arith.constant 0 : index
    %29 = vector.load %arg7[%c0_16, %c0_17] : memref<32x32xbf16, #tpu.memory_space<vmem>>, vector<32x32xbf16>
    %30 = arith.truncf %21 : vector<16x32xf32> to vector<16x32xbf16>
    %cst_18 = arith.constant dense<0.000000e+00> : vector<16x32xf32>
    %31 = tpu.matmul %30, %29, %cst_18 {dimension_numbers = #tpu.dot_dimension_numbers<[1], [0], [0], [1], [0, 0, 1, 1], [], []>} : vector<16x32xbf16>, vector<32x32xbf16>, vector<16x32xf32> -> vector<16x32xf32>
    %c0_19 = arith.constant 0 : index
    %c0_20 = arith.constant 0 : index
    %32 = vector.load %arg13[%c0_19, %c0_20] : memref<1x32xf32, #tpu.memory_space<vmem>>, vector<1x32xf32>
    %33 = vector.broadcast %32 : vector<1x32xf32> to vector<16x32xf32>
    %34 = arith.addf %31, %33 : vector<16x32xf32>
    %c0_21 = arith.constant 0 : index
    %c0_22 = arith.constant 0 : index
    %35 = vector.load %arg23[%c0_21, %c0_22] : memref<16x32xf32, #tpu.memory_space<vmem>>, vector<16x32xf32>
    tpu.vector_store %arg23[%c0_21, %c0_22], %34 {strides = array<i32>} : memref<16x32xf32, #tpu.memory_space<vmem>>, vector<16x32xf32>,
    %c0_23 = arith.constant 0 : index
    %c0_24 = arith.constant 0 : index
    %36 = vector.load %arg8[%c0_23, %c0_24] : memref<32x32xbf16, #tpu.memory_space<vmem>>, vector<32x32xbf16>
    %37 = arith.truncf %21 : vector<16x32xf32> to vector<16x32xbf16>
    %cst_25 = arith.constant dense<0.000000e+00> : vector<16x32xf32>
    %38 = tpu.matmul %37, %36, %cst_25 {dimension_numbers = #tpu.dot_dimension_numbers<[1], [0], [0], [1], [0, 0, 1, 1], [], []>} : vector<16x32xbf16>, vector<32x32xbf16>, vector<16x32xf32> -> vector<16x32xf32>
    %c0_26 = arith.constant 0 : index
    %c0_27 = arith.constant 0 : index
    %39 = vector.load %arg14[%c0_26, %c0_27] : memref<1x32xf32, #tpu.memory_space<vmem>>, vector<1x32xf32>
    %40 = vector.broadcast %39 : vector<1x32xf32> to vector<16x32xf32>
    %41 = arith.addf %38, %40 : vector<16x32xf32>
    %c0_28 = arith.constant 0 : index
    %c0_29 = arith.constant 0 : index
    %42 = vector.load %arg24[%c0_28, %c0_29] : memref<16x32xf32, #tpu.memory_space<vmem>>, vector<16x32xf32>
    tpu.vector_store %arg24[%c0_28, %c0_29], %41 {strides = array<i32>} : memref<16x32xf32, #tpu.memory_space<vmem>>, vector<16x32xf32>,
    %c0_30 = arith.constant 0 : index
    %c0_31 = arith.constant 0 : index
    %43 = vector.load %arg3[%c0_30, %c0_31] : memref<8x1xi32, #tpu.memory_space<vmem>>, vector<8x1xi32>
    %c0_32 = arith.constant 0 : index
    %c0_33 = arith.constant 0 : index
    %44 = vector.load %arg9[%c0_32, %c0_33] : memref<32x32xbf16, #tpu.memory_space<vmem>>, vector<32x32xbf16>
    %c0_34 = arith.constant 0 : index
    %c0_35 = arith.constant 0 : index
    %45 = vector.load %arg10[%c0_34, %c0_35] : memref<32x32xbf16, #tpu.memory_space<vmem>>, vector<32x32xbf16>
    %c0_36 = arith.constant 0 : index
    %c0_37 = arith.constant 0 : index
    %46 = vector.load %arg11[%c0_36, %c0_37] : memref<32x32xbf16, #tpu.memory_space<vmem>>, vector<32x32xbf16>
    %c0_38 = arith.constant 0 : index
    %c0_39 = arith.constant 0 : index
    %47 = vector.load %arg15[%c0_38, %c0_39] : memref<1x32xf32, #tpu.memory_space<vmem>>, vector<1x32xf32>
    %c0_40 = arith.constant 0 : index
    %c0_41 = arith.constant 0 : index
    %48 = vector.load %arg16[%c0_40, %c0_41] : memref<1x32xf32, #tpu.memory_space<vmem>>, vector<1x32xf32>
    %c0_42 = arith.constant 0 : index
    %c0_43 = arith.constant 0 : index
    %49 = vector.load %arg17[%c0_42, %c0_43] : memref<1x32xf32, #tpu.memory_space<vmem>>, vector<1x32xf32>
    %cst_44 = arith.constant 0.000000e+00 : f32
    %50 = vector.broadcast %cst_44 : f32 to vector<8x32xf32>
    %c0_i32 = arith.constant 0 : i32
    %c8_i32 = arith.constant 8 : i32
    %51 = arith.muli %c0_i32, %c8_i32 : i32
    %52 = tpu.assume_multiple %51, 8 : i32
    %53 = arith.index_cast %52 : i32 to index
    %c0_45 = arith.constant 0 : index
    %54 = vector.load %arg22[%53, %c0_45] : memref<16x32xf32, #tpu.memory_space<vmem>>, vector<8x32xf32>
    %55 = arith.index_cast %52 : i32 to index
    %c0_46 = arith.constant 0 : index
    %56 = vector.load %arg23[%55, %c0_46] : memref<16x32xf32, #tpu.memory_space<vmem>>, vector<8x32xf32>
    %57 = arith.index_cast %52 : i32 to index
    %c0_47 = arith.constant 0 : index
    %58 = vector.load %arg24[%57, %c0_47] : memref<16x32xf32, #tpu.memory_space<vmem>>, vector<8x32xf32>
    %59 = arith.truncf %50 : vector<8x32xf32> to vector<8x32xbf16>
    %cst_48 = arith.constant dense<0.000000e+00> : vector<8x32xf32>
    %60 = tpu.matmul %59, %44, %cst_48 {dimension_numbers = #tpu.dot_dimension_numbers<[1], [0], [0], [1], [0, 0, 1, 1], [], []>} : vector<8x32xbf16>, vector<32x32xbf16>, vector<8x32xf32> -> vector<8x32xf32>
    %61 = arith.addf %54, %60 : vector<8x32xf32>
    %62 = vector.broadcast %47 : vector<1x32xf32> to vector<8x32xf32>
    %63 = arith.addf %61, %62 : vector<8x32xf32>
    %64 = arith.negf %63 : vector<8x32xf32>
    %65 = math.exp %64 : vector<8x32xf32>
    %cst_49 = arith.constant 1.000000e+00 : f32
    %66 = vector.broadcast %cst_49 : f32 to vector<8x32xf32>
    %67 = arith.addf %66, %65 : vector<8x32xf32>
    %68 = arith.divf %66, %67 : vector<8x32xf32>
    %69 = arith.truncf %50 : vector<8x32xf32> to vector<8x32xbf16>
    %cst_50 = arith.constant dense<0.000000e+00> : vector<8x32xf32>
    %70 = tpu.matmul %69, %45, %cst_50 {dimension_numbers = #tpu.dot_dimension_numbers<[1], [0], [0], [1], [0, 0, 1, 1], [], []>} : vector<8x32xbf16>, vector<32x32xbf16>, vector<8x32xf32> -> vector<8x32xf32>
    %71 = arith.addf %56, %70 : vector<8x32xf32>
    %72 = vector.broadcast %48 : vector<1x32xf32> to vector<8x32xf32>
    %73 = arith.addf %71, %72 : vector<8x32xf32>
    %74 = arith.negf %73 : vector<8x32xf32>
    %75 = math.exp %74 : vector<8x32xf32>
    %cst_51 = arith.constant 1.000000e+00 : f32
    %76 = vector.broadcast %cst_51 : f32 to vector<8x32xf32>
    %77 = arith.addf %76, %75 : vector<8x32xf32>
    %78 = arith.divf %76, %77 : vector<8x32xf32>
    %79 = arith.truncf %50 : vector<8x32xf32> to vector<8x32xbf16>
    %cst_52 = arith.constant dense<0.000000e+00> : vector<8x32xf32>
    %80 = tpu.matmul %79, %46, %cst_52 {dimension_numbers = #tpu.dot_dimension_numbers<[1], [0], [0], [1], [0, 0, 1, 1], [], []>} : vector<8x32xbf16>, vector<32x32xbf16>, vector<8x32xf32> -> vector<8x32xf32>
    %81 = vector.broadcast %49 : vector<1x32xf32> to vector<8x32xf32>
    %82 = arith.addf %80, %81 : vector<8x32xf32>
    %83 = arith.mulf %68, %82 : vector<8x32xf32>
    %84 = arith.addf %58, %83 : vector<8x32xf32>
    %85 = math.tanh %84 : vector<8x32xf32>
    %cst_53 = arith.constant 1.000000e+00 : f32
    %86 = vector.broadcast %cst_53 : f32 to vector<8x32xf32>
    %87 = arith.subf %86, %78 : vector<8x32xf32>
    %88 = arith.mulf %87, %85 : vector<8x32xf32>
    %89 = arith.mulf %78, %50 : vector<8x32xf32>
    %90 = arith.addf %88, %89 : vector<8x32xf32>
    %91 = vector.broadcast %c0_i32 : i32 to vector<8x1xi32>
    %92 = arith.cmpi sgt, %43, %91 : vector<8x1xi32>
    %93 = vector.shape_cast %92 : vector<8x1xi1> to vector<8x1xi1>
    %94 = vector.broadcast %93 : vector<8x1xi1> to vector<8x32xi1>
    %95 = arith.select %94, %90, %50 : vector<8x32xi1>, vector<8x32xf32>
    %c1_i32 = arith.constant 1 : i32
    %c8_i32_54 = arith.constant 8 : i32
    %96 = arith.muli %c1_i32, %c8_i32_54 : i32
    %97 = tpu.assume_multiple %96, 8 : i32
    %98 = arith.index_cast %97 : i32 to index
    %c0_55 = arith.constant 0 : index
    %99 = vector.load %arg22[%98, %c0_55] : memref<16x32xf32, #tpu.memory_space<vmem>>, vector<8x32xf32>
    %100 = arith.index_cast %97 : i32 to index
    %c0_56 = arith.constant 0 : index
    %101 = vector.load %arg23[%100, %c0_56] : memref<16x32xf32, #tpu.memory_space<vmem>>, vector<8x32xf32>
    %102 = arith.index_cast %97 : i32 to index
    %c0_57 = arith.constant 0 : index
    %103 = vector.load %arg24[%102, %c0_57] : memref<16x32xf32, #tpu.memory_space<vmem>>, vector<8x32xf32>
    %104 = arith.truncf %95 : vector<8x32xf32> to vector<8x32xbf16>
    %cst_58 = arith.constant dense<0.000000e+00> : vector<8x32xf32>
    %105 = tpu.matmul %104, %44, %cst_58 {dimension_numbers = #tpu.dot_dimension_numbers<[1], [0], [0], [1], [0, 0, 1, 1], [], []>} : vector<8x32xbf16>, vector<32x32xbf16>, vector<8x32xf32> -> vector<8x32xf32>
    %106 = arith.addf %99, %105 : vector<8x32xf32>
    %107 = vector.broadcast %47 : vector<1x32xf32> to vector<8x32xf32>
    %108 = arith.addf %106, %107 : vector<8x32xf32>
    %109 = arith.negf %108 : vector<8x32xf32>
    %110 = math.exp %109 : vector<8x32xf32>
    %cst_59 = arith.constant 1.000000e+00 : f32
    %111 = vector.broadcast %cst_59 : f32 to vector<8x32xf32>
    %112 = arith.addf %111, %110 : vector<8x32xf32>
    %113 = arith.divf %111, %112 : vector<8x32xf32>
    %114 = arith.truncf %95 : vector<8x32xf32> to vector<8x32xbf16>
    %cst_60 = arith.constant dense<0.000000e+00> : vector<8x32xf32>
    %115 = tpu.matmul %114, %45, %cst_60 {dimension_numbers = #tpu.dot_dimension_numbers<[1], [0], [0], [1], [0, 0, 1, 1], [], []>} : vector<8x32xbf16>, vector<32x32xbf16>, vector<8x32xf32> -> vector<8x32xf32>
    %116 = arith.addf %101, %115 : vector<8x32xf32>
    %117 = vector.broadcast %48 : vector<1x32xf32> to vector<8x32xf32>
    %118 = arith.addf %116, %117 : vector<8x32xf32>
    %119 = arith.negf %118 : vector<8x32xf32>
    %120 = math.exp %119 : vector<8x32xf32>
    %cst_61 = arith.constant 1.000000e+00 : f32
    %121 = vector.broadcast %cst_61 : f32 to vector<8x32xf32>
    %122 = arith.addf %121, %120 : vector<8x32xf32>
    %123 = arith.divf %121, %122 : vector<8x32xf32>
    %124 = arith.truncf %95 : vector<8x32xf32> to vector<8x32xbf16>
    %cst_62 = arith.constant dense<0.000000e+00> : vector<8x32xf32>
    %125 = tpu.matmul %124, %46, %cst_62 {dimension_numbers = #tpu.dot_dimension_numbers<[1], [0], [0], [1], [0, 0, 1, 1], [], []>} : vector<8x32xbf16>, vector<32x32xbf16>, vector<8x32xf32> -> vector<8x32xf32>
    %126 = vector.broadcast %49 : vector<1x32xf32> to vector<8x32xf32>
    %127 = arith.addf %125, %126 : vector<8x32xf32>
    %128 = arith.mulf %113, %127 : vector<8x32xf32>
    %129 = arith.addf %103, %128 : vector<8x32xf32>
    %130 = math.tanh %129 : vector<8x32xf32>
    %cst_63 = arith.constant 1.000000e+00 : f32
    %131 = vector.broadcast %cst_63 : f32 to vector<8x32xf32>
    %132 = arith.subf %131, %123 : vector<8x32xf32>
    %133 = arith.mulf %132, %130 : vector<8x32xf32>
    %134 = arith.mulf %123, %95 : vector<8x32xf32>
    %135 = arith.addf %133, %134 : vector<8x32xf32>
    %136 = vector.broadcast %c1_i32 : i32 to vector<8x1xi32>
    %137 = arith.cmpi sgt, %43, %136 : vector<8x1xi32>
    %138 = vector.shape_cast %137 : vector<8x1xi1> to vector<8x1xi1>
    %139 = vector.broadcast %138 : vector<8x1xi1> to vector<8x32xi1>
    %140 = arith.select %139, %135, %95 : vector<8x32xi1>, vector<8x32xf32>
    %c2_i32 = arith.constant 2 : i32
    %c0_64 = arith.constant 0 : index
    %c0_65 = arith.constant 0 : index
    %141 = vector.load %arg18[%c0_64, %c0_65] : memref<32x32xbf16, #tpu.memory_space<vmem>>, vector<32x32xbf16>
    %142 = arith.truncf %6 : vector<8x32xf32> to vector<8x32xbf16>
    %cst_66 = arith.constant dense<0.000000e+00> : vector<8x32xf32>
    %143 = tpu.matmul %142, %141, %cst_66 {dimension_numbers = #tpu.dot_dimension_numbers<[1], [0], [0], [1], [0, 0, 1, 1], [], []>} : vector<8x32xbf16>, vector<32x32xbf16>, vector<8x32xf32> -> vector<8x32xf32>
    %c0_67 = arith.constant 0 : index
    %c0_68 = arith.constant 0 : index
    %144 = vector.load %arg19[%c0_67, %c0_68] : memref<32x32xbf16, #tpu.memory_space<vmem>>, vector<32x32xbf16>
    %145 = arith.truncf %140 : vector<8x32xf32> to vector<8x32xbf16>
    %cst_69 = arith.constant dense<0.000000e+00> : vector<8x32xf32>
    %146 = tpu.matmul %145, %144, %cst_69 {dimension_numbers = #tpu.dot_dimension_numbers<[1], [0], [0], [1], [0, 0, 1, 1], [], []>} : vector<8x32xbf16>, vector<32x32xbf16>, vector<8x32xf32> -> vector<8x32xf32>
    %147 = arith.addf %143, %146 : vector<8x32xf32>
    %c0_70 = arith.constant 0 : index
    %c0_71 = arith.constant 0 : index
    %148 = vector.load %arg20[%c0_70, %c0_71] : memref<1x32xf32, #tpu.memory_space<vmem>>, vector<1x32xf32>
    %cst_72 = arith.constant 0.000000e+00 : f32
    %149 = vector.broadcast %cst_72 : f32 to vector<8x32xf32>
    %150 = arith.cmpf oge, %147, %149 : vector<8x32xf32>
    %151 = vector.broadcast %148 : vector<1x32xf32> to vector<8x32xf32>
    %152 = arith.mulf %151, %147 : vector<8x32xf32>
    %153 = arith.select %150, %147, %152 : vector<8x32xi1>, vector<8x32xf32>
    %c0_73 = arith.constant 0 : index
    %c0_74 = arith.constant 0 : index
    %154 = vector.load %arg21[%c0_73, %c0_74] : memref<8x64xf32, #tpu.memory_space<vmem>>, vector<8x32xf32>
    tpu.vector_store %arg21[%c0_73, %c0_74], %153 {strides = array<i32>} : memref<8x64xf32, #tpu.memory_space<vmem>>, vector<8x32xf32>,
    %c0_75 = arith.constant 0 : index
    %c32 = arith.constant 32 : index
    %155 = vector.load %arg21[%c0_75, %c32] : memref<8x64xf32, #tpu.memory_space<vmem>>, vector<8x32xf32>
    tpu.vector_store %arg21[%c0_75, %c32], %2 {strides = array<i32>} : memref<8x64xf32, #tpu.memory_space<vmem>>, vector<8x32xf32>,
    return
  }
  func.func @transform_0(%arg0: i32) -> (i32, i32) {
    %c0_i32 = arith.constant 0 : i32
    %c0_i32_0 = arith.constant 0 : i32
    return %arg0, %c0_i32 : i32, i32
  }
  func.func @transform_1(%arg0: i32) -> (i32, i32, i32) {
    %c0_i32 = arith.constant 0 : i32
    %c0_i32_0 = arith.constant 0 : i32
    %c0_i32_1 = arith.constant 0 : i32
    return %c0_i32, %arg0, %c0_i32_0 : i32, i32, i32
  }
  func.func @transform_2(%arg0: i32) -> (i32, i32) {
    %c0_i32 = arith.constant 0 : i32
    %c0_i32_0 = arith.constant 0 : i32
    return %arg0, %c0_i32 : i32, i32
  }
  func.func @transform_3(%arg0: i32) -> (i32, i32) {
    %c0_i32 = arith.constant 0 : i32
    %c0_i32_0 = arith.constant 0 : i32
    %c0_i32_1 = arith.constant 0 : i32
    return %c0_i32, %c0_i32_0 : i32, i32
  }
  func.func @transform_4(%arg0: i32) -> (i32, i32) {
    %c0_i32 = arith.constant 0 : i32
    %c0_i32_0 = arith.constant 0 : i32
    %c0_i32_1 = arith.constant 0 : i32
    return %c0_i32, %c0_i32_0 : i32, i32
  }
  func.func @transform_5(%arg0: i32) -> (i32, i32) {
    %c0_i32 = arith.constant 0 : i32
    %c0_i32_0 = arith.constant 0 : i32
    %c0_i32_1 = arith.constant 0 : i32
    return %c0_i32, %c0_i32_0 : i32, i32
  }
  func.func @transform_6(%arg0: i32) -> (i32, i32) {
    %c0_i32 = arith.constant 0 : i32
    %c0_i32_0 = arith.constant 0 : i32
    %c0_i32_1 = arith.constant 0 : i32
    return %c0_i32, %c0_i32_0 : i32, i32
  }
  func.func @transform_7(%arg0: i32) -> (i32, i32) {
    %c0_i32 = arith.constant 0 : i32
    %c0_i32_0 = arith.constant 0 : i32
    %c0_i32_1 = arith.constant 0 : i32
    return %c0_i32, %c0_i32_0 : i32, i32
  }
  func.func @transform_8(%arg0: i32) -> (i32, i32) {
    %c0_i32 = arith.constant 0 : i32
    %c0_i32_0 = arith.constant 0 : i32
    %c0_i32_1 = arith.constant 0 : i32
    return %c0_i32, %c0_i32_0 : i32, i32
  }
  func.func @transform_9(%arg0: i32) -> (i32, i32) {
    %c0_i32 = arith.constant 0 : i32
    %c0_i32_0 = arith.constant 0 : i32
    %c0_i32_1 = arith.constant 0 : i32
    return %c0_i32, %c0_i32_0 : i32, i32
  }
  func.func @transform_10(%arg0: i32) -> (i32, i32) {
    %c0_i32 = arith.constant 0 : i32
    %c0_i32_0 = arith.constant 0 : i32
    %c0_i32_1 = arith.constant 0 : i32
    return %c0_i32, %c0_i32_0 : i32, i32
  }
  func.func @transform_11(%arg0: i32) -> (i32, i32) {
    %c0_i32 = arith.constant 0 : i32
    %c0_i32_0 = arith.constant 0 : i32
    %c0_i32_1 = arith.constant 0 : i32
    return %c0_i32, %c0_i32_0 : i32, i32
  }
  func.func @transform_12(%arg0: i32) -> (i32, i32) {
    %c0_i32 = arith.constant 0 : i32
    %c0_i32_0 = arith.constant 0 : i32
    %c0_i32_1 = arith.constant 0 : i32
    return %c0_i32, %c0_i32_0 : i32, i32
  }
  func.func @transform_13(%arg0: i32) -> (i32, i32) {
    %c0_i32 = arith.constant 0 : i32
    %c0_i32_0 = arith.constant 0 : i32
    %c0_i32_1 = arith.constant 0 : i32
    return %c0_i32, %c0_i32_0 : i32, i32
  }
  func.func @transform_14(%arg0: i32) -> (i32, i32) {
    %c0_i32 = arith.constant 0 : i32
    %c0_i32_0 = arith.constant 0 : i32
    %c0_i32_1 = arith.constant 0 : i32
    return %c0_i32, %c0_i32_0 : i32, i32
  }
  func.func @transform_15(%arg0: i32) -> (i32, i32) {
    %c0_i32 = arith.constant 0 : i32
    %c0_i32_0 = arith.constant 0 : i32
    %c0_i32_1 = arith.constant 0 : i32
    return %c0_i32, %c0_i32_0 : i32, i32
  }
  func.func @transform_16(%arg0: i32) -> (i32, i32) {
    %c0_i32 = arith.constant 0 : i32
    %c0_i32_0 = arith.constant 0 : i32
    %c0_i32_1 = arith.constant 0 : i32
    return %c0_i32, %c0_i32_0 : i32, i32
  }
  func.func @transform_17(%arg0: i32) -> (i32, i32) {
    %c0_i32 = arith.constant 0 : i32
    %c0_i32_0 = arith.constant 0 : i32
    %c0_i32_1 = arith.constant 0 : i32
    return %c0_i32, %c0_i32_0 : i32, i32
  }
  func.func @transform_18(%arg0: i32) -> (i32, i32) {
    %c0_i32 = arith.constant 0 : i32
    %c0_i32_0 = arith.constant 0 : i32
    %c0_i32_1 = arith.constant 0 : i32
    return %c0_i32, %c0_i32_0 : i32, i32
  }
  func.func @transform_19(%arg0: i32) -> (i32, i32) {
    %c0_i32 = arith.constant 0 : i32
    %c0_i32_0 = arith.constant 0 : i32
    %c0_i32_1 = arith.constant 0 : i32
    return %c0_i32, %c0_i32_0 : i32, i32
  }
  func.func @transform_20(%arg0: i32) -> (i32, i32) {
    %c0_i32 = arith.constant 0 : i32
    %c0_i32_0 = arith.constant 0 : i32
    return %arg0, %c0_i32 : i32, i32
  }
}

</mosaic_0001>

<bundles_post_ra>
// kernel: tpu_custom_call.1
= control target key start
LH: loop header
LB: loop body
LE: loop exit
PB: predicated region body
PF: predicated region fallthrough
CT: control target
= control target key end

     0   :  { %s1835_s0 = inlined_call_operand.hbm [shape: f32[8,32], index: 0, kind: input, shape index: {}]   ;;  %s1836_s1 = inlined_call_operand.hbm [shape: bf16[2,8,32], index: 1, kind: input, shape index: {}]   ;;  %s1837_s2 = inlined_call_operand.vmem [shape: s32[8,1], index: 2, kind: input, shape index: {}]   ;;  %s1838_s3 = inlined_call_operand.hbm [shape: f32[1,32], index: 3, kind: input, shape index: {}]   ;;  %s1839_s4 = inlined_call_operand.hbm [shape: f32[1,32], index: 4, kind: input, shape index: {}]   ;;  %s1840_s5 = inlined_call_operand.vmem [shape: bf16[32,32], index: 5, kind: input, shape index: {}]   ;;  %s1841_s6 = inlined_call_operand.hbm [shape: bf16[32,32], index: 6, kind: input, shape index: {}]   ;;  %s1842_s7 = inlined_call_operand.hbm [shape: bf16[32,32], index: 7, kind: input, shape index: {}]   ;;  %s1843_s8 = inlined_call_operand.hbm [shape: bf16[32,32], index: 8, kind: input, shape index: {}]   ;;  %s1844_s9 = inlined_call_operand.hbm [shape: bf16[32,32], index: 9, kind: input, shape index: {}]   ;;  %s1845_s10 = inlined_call_operand.hbm [shape: bf16[32,32], index: 10, kind: input, shape index: {}]   ;;  %s1846_s11 = inlined_call_operand.hbm [shape: f32[1,32], index: 11, kind: input, shape index: {}]   ;;  %s1847_s12 = inlined_call_operand.hbm [shape: f32[1,32], index: 12, kind: input, shape index: {}]   ;;  %s1848_s13 = inlined_call_operand.hbm [shape: f32[1,32], index: 13, kind: input, shape index: {}]   ;;  %s1849_s14 = inlined_call_operand.vmem [shape: f32[1,32], index: 14, kind: input, shape index: {}]   ;;  %s1850_s15 = inlined_call_operand.vmem [shape: f32[1,32], index: 15, kind: input, shape index: {}]   ;;  %s1851_s16 = inlined_call_operand.vmem [shape: f32[1,32], index: 16, kind: input, shape index: {}]   ;;  %s1852_s17 = inlined_call_operand.vmem [shape: bf16[32,32], index: 17, kind: input, shape index: {}]   ;;  %s1853_s18 = inlined_call_operand.hbm [shape: bf16[32,32], index: 18, kind: input, shape index: {}]   ;;  %s1854_s19 = inlined_call_operand.vmem [shape: f32[1,32], index: 19, kind: input, shape index: {}]   ;;  %s1855_s20 = inlined_call_operand.hbm [shape: f32[8,64], index: 20, kind: output, shape index: {}]  }
   0x1   :  { %1856 = sst [smem:[#allocation35_spill]] %s1835_s0 }
   0x2   :  { %1857 = sst [smem:[#allocation36_spill]] %s1836_s1 }
   0x3   :  { %1858 = sst [smem:[#allocation37_spill]] %s1837_s2 }
   0x4   :  { %1859 = sst [smem:[#allocation38_spill]] %s1838_s3 }
   0x5   :  { %1860 = sst [smem:[#allocation39_spill]] %s1839_s4 }
   0x6   :  { %25 = vsyncpa [#allocation6], 0 }
   0x7   :  { %26 = vsyncpa [#allocation9], 0 }
   0x8   :  { %27 = vsyncpa [#allocation12], 0 }
   0x9   :  { %28 = vsyncpa [#allocation15], 0 }
   0xa   :  { %29 = vsyncpa [#allocation18], 0 }
   0xb   :  { %30 = vsyncpa [#allocation21], 0 }
   0xc   :  { %31 = vsyncpa [#allocation24], 0 }
   0xd   :  { %32 = vsyncpa [#allocation7], 0  ;;  %s1519_s1 = smov [#allocation8]  }
   0xe   :  { %s48_s22 = sshll.u32 %s1519_s1, 4  ;;  %s49_s22 = int_to_ptr.vmem [resolvable:$true] %s48_s22 }
   0xf   :  { %s1231_s23 = scalar_lea.vmem %s49_s22, 128  ;;  %p1236_p1 = scmp.lt.s32.totalorder %s49_s22, %s49_s22 }
  0x10   :  { %p1232_p0 = scmp.ne.s32.totalorder %s49_s22, %s1231_s23  ;;  %p1237_p2 = scmp.lt.s32.totalorder %s1231_s23, %s1231_s23 }
  0x12   :  { %p1238_p3 = por %p1237_p2, %p1236_p1 }
  0x14   :  { %p1239_p4 = pnand %p1238_p3, %p1232_p0 }
  0x16   :  { %1242 = shalt.err (!%p1239_p4)
}
  0x17   :  { %s1520_s24 = smov 64   ;;  %s1521_s2 = smov 4  }
  0x18   :  { %s1861_s26 = sld [smem:[#allocation36_spill]]  ;;  %s1522_s27 = smov [#allocation11]  }
  0x19   :  { %s73_s28 = sshll.u32 %s1522_s27, 4  ;;  %s1523_s4 = smov [#allocation14]   ;;  %s74_s28 = int_to_ptr.vmem [resolvable:$true] %s73_s28 }
  0x1a   :  { %s96_s29 = sshll.u32 %s1523_s4, 4  ;;  %s1251_s30 = scalar_lea.vmem %s74_s28, 16  ;;  %s97_s29 = int_to_ptr.vmem [resolvable:$true] %s96_s29 }
  0x1b   :  { %p1252_p5 = scmp.ne.s32.totalorder %s74_s28, %s1251_s30  ;;  %s1255_s0 = scalar_lea.vmem %s74_s28, 32 }
  0x1c   :  { %p1256_p6 = scmp.lt.s32.totalorder %s74_s28, %s74_s28  ;;  %p1257_p7 = scmp.lt.s32.totalorder %s1255_s0, %s1251_s30 }
  0x1e   :  { %54 = dma.hbm_to_vmem [thread:$0]  %s1861_s26, 128, %s49_s22, [#allocation9], %s1520_s24, %s1520_s24, %s1521_s2  }
  0x1f   :  { %p1258_p8 = por %p1257_p7, %p1256_p6 }
  0x21   :  { %p1259_p9 = pnand %p1258_p8, %p1252_p5 }
  0x23   :  { %1262 = shalt.err (!%p1259_p9)
}
  0x24   :  { %s1862_s23 = sld [smem:[#allocation39_spill]]  ;;  %s1271_s25 = scalar_lea.vmem %s97_s29, 256 }
  0x25   :  { %p1272_p10 = scmp.ne.s32.totalorder %s97_s29, %s1271_s25  ;;  %p1276_p11 = scmp.lt.s32.totalorder %s97_s29, %s97_s29 }
  0x26   :  { %p1277_p12 = scmp.lt.s32.totalorder %s1271_s25, %s1271_s25 }
  0x28   :  { %p1278_p13 = por %p1277_p12, %p1276_p11 }
  0x2a   :  { %76 = dma.hbm_to_vmem [thread:$0]  %s1862_s23, 16, %s74_s28, [#allocation12]  }
  0x2b   :  { %p1279_p0 = pnand %p1278_p13, %p1272_p10 }
  0x2d   :  { %1282 = shalt.err (!%p1279_p0)
}
  0x2e   :  { %102 = dma.hbm_to_vmem [thread:$0]  %s1842_s7, 256, %s97_s29, [#allocation15], %s1520_s24, %s1520_s24, %s1521_s2  }
  0x2f   :  { %s1524_s26 = smov [#allocation17]   ;;  %s1525_s4 = smov [#allocation20]  }
  0x30   :  { %s120_s27 = sshll.u32 %s1524_s26, 4  ;;  %s145_s28 = sshll.u32 %s1525_s4, 4  ;;  %s121_s27 = int_to_ptr.vmem [resolvable:$true] %s120_s27  ;;  %s146_s28 = int_to_ptr.vmem [resolvable:$true] %s145_s28 }
  0x31   :  { %s1291_s30 = scalar_lea.vmem %s121_s27, 256  ;;  %p1296_p2 = scmp.lt.s32.totalorder %s121_s27, %s121_s27 }
  0x32   :  { %p1292_p1 = scmp.ne.s32.totalorder %s121_s27, %s1291_s30  ;;  %p1297_p3 = scmp.lt.s32.totalorder %s1291_s30, %s1291_s30 }
  0x34   :  { %p1298_p4 = por %p1297_p3, %p1296_p2 }
  0x36   :  { %p1299_p5 = pnand %p1298_p4, %p1292_p1 }
  0x38   :  { %1302 = shalt.err (!%p1299_p5)
}
  0x39   :  { %126 = dma.hbm_to_vmem [thread:$0]  %s1844_s9, 256, %s121_s27, [#allocation18], %s1520_s24, %s1520_s24, %s1521_s2  }
  0x3a   :  { %s1311_s7 = scalar_lea.vmem %s146_s28, 16  ;;  %s1315_s29 = scalar_lea.vmem %s146_s28, 32 }
  0x3b   :  { %p1312_p6 = scmp.ne.s32.totalorder %s146_s28, %s1311_s7  ;;  %p1316_p7 = scmp.lt.s32.totalorder %s146_s28, %s146_s28 }
  0x3c   :  { %p1317_p8 = scmp.lt.s32.totalorder %s1315_s29, %s1311_s7 }
  0x3e   :  { %p1318_p9 = por %p1317_p8, %p1316_p7 }
  0x40   :  { %p1319_p10 = pnand %p1318_p9, %p1312_p6 }
  0x42   :  { %1322 = shalt.err (!%p1319_p10)
}
  0x43   :  { %148 = dma.hbm_to_vmem [thread:$0]  %s1846_s11, 16, %s146_s28, [#allocation21]  }
  0x44   :  { %s1526_s25 = smov [#allocation23]   ;;  %s1527_s3 = smov [#allocation5]  }
  0x45   :  { %s165_s22 = sshll.u32 %s1526_s25, 4  ;;  %s39_s26 = sshll.u32 %s1527_s3, 4  ;;  %s166_s22 = int_to_ptr.vmem [resolvable:$true] %s165_s22  ;;  %s40_s26 = int_to_ptr.vmem [resolvable:$true] %s39_s26 }
  0x46   :  { %s1331_s4 = scalar_lea.vmem %s166_s22, 16  ;;  %s1335_s9 = scalar_lea.vmem %s166_s22, 32 }
  0x47   :  { %p1332_p11 = scmp.ne.s32.totalorder %s166_s22, %s1331_s4  ;;  %p1336_p12 = scmp.lt.s32.totalorder %s166_s22, %s166_s22 }
  0x48   :  { %p1337_p13 = scmp.lt.s32.totalorder %s1335_s9, %s1331_s4 }
  0x4a   :  { %p1338_p0 = por %p1337_p13, %p1336_p12 }
  0x4c   :  { %p1339_p1 = pnand %p1338_p0, %p1332_p11 }
  0x4e   :  { %1342 = shalt.err (!%p1339_p1)
}
  0x4f   :  { %168 = dma.hbm_to_vmem [thread:$0]  %s1848_s13, 16, %s166_s22, [#allocation24]  }
  0x50   :  { %s1351_s0 = scalar_lea.vmem %s40_s26, 128  ;;  %p1356_p3 = scmp.lt.s32.totalorder %s40_s26, %s40_s26 }
  0x51   :  { %p1352_p2 = scmp.ne.s32.totalorder %s40_s26, %s1351_s0  ;;  %p1357_p4 = scmp.lt.s32.totalorder %s1351_s0, %s1351_s0 }
  0x53   :  { %p1358_p5 = por %p1357_p4, %p1356_p3 }
  0x55   :  { %p1359_p6 = pnand %p1358_p5, %p1352_p2 }
  0x57   :  { %1362 = shalt.err (!%p1359_p6)
}
  0x58   :  { %s1863_s21 = sld [smem:[#allocation35_spill]]  ;;  %s1528_s7 = smov [#allocation10]  }
  0x59   :  { %s63_s29 = sshll.u32 %s1528_s7, 4  ;;  %s1529_s1 = smov [#allocation13]   ;;  %s64_s29 = int_to_ptr.vmem [resolvable:$true] %s63_s29 }
  0x5a   :  { %s84_s23 = sshll.u32 %s1529_s1, 4  ;;  %s1371_s25 = scalar_lea.vmem %s64_s29, 16  ;;  %s85_s23 = int_to_ptr.vmem [resolvable:$true] %s84_s23 }
  0x5b   :  { %p1372_p7 = scmp.ne.s32.totalorder %s64_s29, %s1371_s25  ;;  %s1375_s13 = scalar_lea.vmem %s64_s29, 32 }
  0x5c   :  { %p1376_p8 = scmp.lt.s32.totalorder %s64_s29, %s64_s29  ;;  %p1377_p9 = scmp.lt.s32.totalorder %s1375_s13, %s1371_s25 }
  0x5e   :  { %42 = dma.hbm_to_vmem [thread:$0]  %s1863_s21, 128, %s40_s26, [#allocation6]  }
  0x5f   :  { %p1378_p10 = por %p1377_p9, %p1376_p8 }
  0x61   :  { %p1379_p11 = pnand %p1378_p10, %p1372_p7 }
  0x63   :  { %1382 = shalt.err (!%p1379_p11)
}
  0x64   :  { %s1864_s4 = sld [smem:[#allocation38_spill]]  ;;  %s1391_s9 = scalar_lea.vmem %s85_s23, 256 }
  0x65   :  { %p1392_p12 = scmp.ne.s32.totalorder %s85_s23, %s1391_s9  ;;  %p1396_p13 = scmp.lt.s32.totalorder %s85_s23, %s85_s23 }
  0x66   :  { %p1397_p0 = scmp.lt.s32.totalorder %s1391_s9, %s1391_s9 }
  0x68   :  { %p1398_p1 = por %p1397_p0, %p1396_p13 }
  0x6a   :  { %66 = dma.hbm_to_vmem [thread:$0]  %s1864_s4, 16, %s64_s29, [#allocation9]  }
  0x6b   :  { %p1399_p2 = pnand %p1398_p1, %p1392_p12 }
  0x6d   :  { %1402 = shalt.err (!%p1399_p2)
}
  0x6e   :  { %90 = dma.hbm_to_vmem [thread:$0]  %s1841_s6, 256, %s85_s23, [#allocation12], %s1520_s24, %s1520_s24, %s1521_s2  }
  0x6f   :  { %s1530_s30 = smov [#allocation16]   ;;  %s1531_s11 = smov [#allocation19]  }
  0x70   :  { %s108_s0 = sshll.u32 %s1530_s30, 4  ;;  %s132_s28 = sshll.u32 %s1531_s11, 4  ;;  %s109_s0 = int_to_ptr.vmem [resolvable:$true] %s108_s0  ;;  %s133_s28 = int_to_ptr.vmem [resolvable:$true] %s132_s28 }
  0x71   :  { %s1411_s21 = scalar_lea.vmem %s109_s0, 256  ;;  %p1416_p4 = scmp.lt.s32.totalorder %s109_s0, %s109_s0 }
  0x72   :  { %p1412_p3 = scmp.ne.s32.totalorder %s109_s0, %s1411_s21  ;;  %p1417_p5 = scmp.lt.s32.totalorder %s1411_s21, %s1411_s21 }
  0x74   :  { %p1418_p6 = por %p1417_p5, %p1416_p4 }
  0x76   :  { %p1419_p7 = pnand %p1418_p6, %p1412_p3 }
  0x78   :  { %1422 = shalt.err (!%p1419_p7)
}
  0x79   :  { %114 = dma.hbm_to_vmem [thread:$0]  %s1843_s8, 256, %s109_s0, [#allocation15], %s1520_s24, %s1520_s24, %s1521_s2  }
  0x7a   :  { %s1431_s6 = scalar_lea.vmem %s133_s28, 256  ;;  %p1436_p9 = scmp.lt.s32.totalorder %s133_s28, %s133_s28 }
  0x7b   :  { %p1432_p8 = scmp.ne.s32.totalorder %s133_s28, %s1431_s6  ;;  %p1437_p10 = scmp.lt.s32.totalorder %s1431_s6, %s1431_s6 }
  0x7d   :  { %p1438_p11 = por %p1437_p10, %p1436_p9 }
  0x7f   :  { %p1439_p12 = pnand %p1438_p11, %p1432_p8 }
  0x81   :  { %1442 = shalt.err (!%p1439_p12)
}
  0x82   :  { %138 = dma.hbm_to_vmem [thread:$0]  %s1845_s10, 256, %s133_s28, [#allocation18], %s1520_s24, %s1520_s24, %s1521_s2  }
  0x83   :  { %s1532_s25 = smov [#allocation22]   ;;  %s1533_s22 = smov [#allocation25]  }
  0x84   :  { %s155_s13 = sshll.u32 %s1532_s25, 4  ;;  %s182_s8 = sshll.u32 %s1533_s22, 4  ;;  %s156_s13 = int_to_ptr.vmem [resolvable:$true] %s155_s13  ;;  %s183_s8 = int_to_ptr.vmem [resolvable:$true] %s182_s8 }
  0x85   :  { %s1451_s3 = scalar_lea.vmem %s156_s13, 16  ;;  %s1455_s4 = scalar_lea.vmem %s156_s13, 32 }
  0x86   :  { %p1452_p13 = scmp.ne.s32.totalorder %s156_s13, %s1451_s3  ;;  %p1456_p0 = scmp.lt.s32.totalorder %s156_s13, %s156_s13 }
  0x87   :  { %p1457_p1 = scmp.lt.s32.totalorder %s1455_s4, %s1451_s3 }
  0x89   :  { %p1458_p2 = por %p1457_p1, %p1456_p0 }
  0x8b   :  { %p1459_p3 = pnand %p1458_p2, %p1452_p13 }
  0x8d   :  { %1462 = shalt.err (!%p1459_p3)
}
  0x8e   :  { %158 = dma.hbm_to_vmem [thread:$0]  %s1847_s12, 16, %s156_s13, [#allocation21]  }
  0x8f   :  { %s1471_s27 = scalar_lea.vmem %s183_s8, 256  ;;  %p1476_p5 = scmp.lt.s32.totalorder %s183_s8, %s183_s8 }
  0x90   :  { %p1472_p4 = scmp.ne.s32.totalorder %s183_s8, %s1471_s27  ;;  %p1477_p6 = scmp.lt.s32.totalorder %s1471_s27, %s1471_s27 }
  0x92   :  { %p1478_p7 = por %p1477_p6, %p1476_p5 }
  0x94   :  { %p1479_p8 = pnand %p1478_p7, %p1472_p4 }
  0x96   :  { %1482 = shalt.err (!%p1479_p8)
}
  0x97   :  { %188 = dma.hbm_to_vmem [thread:$0]  %s1853_s18, 256, %s183_s8, [#allocation24], %s1520_s24, %s1520_s24, %s1521_s2  }
  0x98   :  { %1503 = dma.done.wait [#allocation6], 128  }
  0x99   :  { %1504 = vsyncadd [#allocation6], 4294967168 }
  0x9a   :  { %1505 = dma.done.wait [#allocation9], 144  }
  0x9b   :  { %1506 = vsyncadd [#allocation9], 4294967152 }
  0x9c   :  { %1507 = dma.done.wait [#allocation12], 272  }
  0x9d   :  { %1508 = vsyncadd [#allocation12], 4294967024 }
  0x9e   :  { %1509 = dma.done.wait [#allocation15], 512  }
  0x9f   :  { %1510 = vsyncadd [#allocation15], 4294966784 }
  0xa0   :  { %1511 = dma.done.wait [#allocation18], 512  }
  0xa1   :  { %1512 = vsyncadd [#allocation18], 4294966784 }
  0xa2   :  { %1513 = dma.done.wait [#allocation21], 32  }
  0xa3   :  { %1514 = vsyncadd [#allocation21], 4294967264 }
  0xa4   :  { %1515 = dma.done.wait [#allocation24], 272  }
  0xa5   :  { %1516 = vsyncadd [#allocation24], 4294967024  ;;  %v1534_v0 = vmov 0.0   ;;  %vm1535_vm0 = vmmov 0   ;;  %v1536_v1 = vmov 0   ;;  %v1187_v2 = vld [vmem:[%s1840_s5 + $0x8] sm:$0xff]  }
  0xa6   :  { %1078 = vmatprep.subr.bf16.mxu0 %v1534_v0  ;;  %1086 = vmatprep.subr.bf16.mxu1 %v1534_v0  ;;  %v1188_v3 = vld [vmem:[#allocation13 + $0x8] sm:$0xff]   ;;  %v1189_v4 = vld [vmem:[%s1840_s5] sm:$0xff]   ;;  %v1042_v7 = vld [vmem:[#allocation8] sm:$0xff]   ;;  %vm281_vm1 = vcmask 261120   ;;  %s1865_s11 = sld [smem:[#allocation37_spill]]  ;;  %s1537_s25 = smov 32  }
  0xa7   :  { %1082 = vmatprep.mubr.msk.bf16.mxu0 %vm1535_vm0, %v1534_v0  ;;  %1090 = vmatprep.mubr.msk.bf16.mxu1 %vm1535_vm0, %v1534_v0  ;;  %v1190_v5 = vld [vmem:[#allocation13] sm:$0xff]   ;;  %v1719_v6 = vld [vmem:[#allocation10] ss:$0 sm:$0xff]  ;;  %v1043_v8 = vunpack.c.l.bf16 %v1042_v7  ;;  %v1044_v9 = vunpack.c.h.bf16 %v1042_v7  ;;  %v1721_v10 = vld [vmem:[#allocation11] ss:$0 sm:$0xff]  ;;  %s1538_s22 = smov [#allocation26]  }
  0xa8   :  { %1186 = vset.pattern.permute.xlu0 %v1536_v1  ;;  %1079 = vmatpush3.bf16.msra.mxu0 %v1187_v2  ;;  %v1191_v15 = vld [vmem:[#allocation14 + $0x8] sm:$0xff]   ;;  %v1192_v16 = vld [vmem:[#allocation16 + $0x8] sm:$0xff]   ;;  %v1193_v18 = vld [vmem:[#allocation14] sm:$0xff]   ;;  %s989_s8 = sshll.u32 %s1538_s22, 4  ;;  %vm981_vm7 = vcmask 523520   ;;  %s990_s8 = int_to_ptr.vmem [resolvable:$true] %s989_s8 }
  0xa9   :  { %1087 = vmatpush3.bf16.msra.mxu1 %v1188_v3  ;;  %1080 = vmatprep.subr.bf16.mxu0 %v1534_v0  ;;  %v250_v11 = vmul.f32 %v1043_v8, %v1719_v6  ;;  %v255_v12 = vmul.f32 %v1044_v9, %v1719_v6  ;;  %v1194_v20 = vld [vmem:[#allocation16] sm:$0xff]   ;;  %v1195_v22 = vld [vmem:[#allocation17 + $0x8] sm:$0xff]   ;;  %v1743_v23 = vld [vmem:[#allocation19 + $0x8] sm:$0xff]   ;;  %s1483_s3 = scalar_lea.vmem %s990_s8, 128  ;;  %p1488_p10 = scmp.lt.s32.totalorder %s990_s8, %s990_s8 }
  0xaa   :  { %1088 = vmatprep.subr.bf16.mxu1 %v1534_v0  ;;  %v1196_v24 = vld [vmem:[#allocation17] sm:$0xff]   ;;  %v1752_v26 = vld [vmem:[#allocation19] sm:$0xff]   ;;  %v1777_v45 = vld [vmem:[%s1849_s14] ss:$0 sm:$0xff]  ;;  %p1484_p9 = scmp.ne.s32.totalorder %s990_s8, %s1483_s3  ;;  %p1489_p11 = scmp.lt.s32.totalorder %s1483_s3, %s1483_s3 }
  0xab   :  { %v251_v13 = vadd.f32 %v1721_v10, %v250_v11  ;;  %v256_v14 = vadd.f32 %v1721_v10, %v255_v12  ;;  %v1006_v27 = vld [vmem:[#allocation20] ss:$0 sm:$0xff]  ;;  %v1010_v28 = vld [vmem:[#allocation22] ss:$0 sm:$0xff]  ;;  %v1014_v41 = vld [vmem:[#allocation23] ss:$0 sm:$0xff] }
  0xac   :  { %1081 = vmatpush3.bf16.msra.mxu0 %v1189_v4  ;;  %v460_v19 = vld [vmem:[%s1865_s11] sm:$0xff]  ;;  %p1490_p12 = por %p1489_p11, %p1488_p10 }
  0xad   :  { %1089 = vmatpush3.bf16.msra.mxu1 %v1190_v5  ;;  %1094 = vmatprep.subr.bf16.mxu0 %v1534_v0  ;;  %v261_v17 = vpack.c.bf16 %v256_v14, %v251_v13  ;;  %vm679_vm2 = vcmp.gt.s32.totalorder %v460_v19, 0  ;;  %vm839_vm3 = vcmp.gt.s32.totalorder %v460_v19, 1  ;;  %v1785_v57 = vld [vmem:[%s1850_s15] ss:$0 sm:$0xff] }
  0xae   :  { %1102 = vmatprep.subr.bf16.mxu1 %v1534_v0  ;;  %v680_v21 = vsel %vm679_vm2, 1, %v1536_v1  ;;  %v840_v25 = vsel %vm839_vm3, 1, %v1536_v1  ;;  %v1791_v12 = vld [vmem:[%s1851_s16] ss:$0 sm:$0xff]  ;;  %p1491_p13 = pnand %p1490_p12, %p1484_p9 }
  0xaf   :  { %1083 = vmatmul.mubr.msk.bf16.vlgmr.msra.gmra.mxu0 %vm281_vm1, %v261_v17  ;;  %682 = vperm.xlu0 %1186, %v680_v21  }
  0xb0   :  { %1091 = vmatmul.mubr.msk.bf16.vlgmr.msra.gmra.mxu1 %vm281_vm1, %v261_v17  ;;  %1095 = vmatpush3.bf16.msra.mxu0 %v1191_v15 }
  0xb1   :  { %1103 = vmatpush3.bf16.msra.mxu1 %v1192_v16  ;;  %1096 = vmatprep.subr.bf16.mxu0 %v1534_v0 }
  0xb2   :  { %1104 = vmatprep.subr.bf16.mxu1 %v1534_v0  ;;  %1098 = vmatprep.mubr.msk.bf16.mxu0 %vm1535_vm0, %v1534_v0 }
  0xb3   :  { %1106 = vmatprep.mubr.msk.bf16.mxu1 %vm1535_vm0, %v1534_v0  ;;  %842 = vperm.xlu0 %1186, %v840_v25  }
  0xb4   :  { %1097 = vmatpush3.bf16.msra.mxu0 %v1193_v18 }
  0xb5   :  { %1105 = vmatpush3.bf16.msra.mxu1 %v1194_v20  ;;  %1110 = vmatprep.subr.bf16.mxu0 %v1534_v0 }
  0xb6   :  { %1118 = vmatprep.subr.bf16.mxu1 %v1534_v0 }
  0xb7   :  { %1099 = vmatmul.mubr.msk.bf16.vlgmr.msra.gmra.mxu0 %vm281_vm1, %v261_v17 }
  0xb8   :  { %1107 = vmatmul.mubr.bf16.vlgmr.msra.gmra.mxu1 %v1536_v1  ;;  %1111 = vmatpush3.bf16.msra.mxu0 %v1195_v22 }
  0xb9   :  { %1114 = vmatprep.mubr.msk.bf16.mxu0 %vm1535_vm0, %v1534_v0  ;;  %1112 = vmatprep.subr.bf16.mxu0 %v1534_v0 }
  0xba   :  { %1119 = vmatpush3.bf16.msra.mxu1 %v1743_v23  ;;  %1122 = vmatprep.mubr.msk.bf16.mxu1 %vm1535_vm0, %v1534_v0 }
  0xbb   :  { %1120 = vmatprep.subr.bf16.mxu1 %v1534_v0 }
  0xbc   :  { %1113 = vmatpush3.bf16.msra.mxu0 %v1196_v24 }
  0xbd   :  { %1126 = vmatprep.subr.bf16.mxu0 %v1534_v0 }
  0xbe   :  { %1121 = vmatpush3.bf16.msra.mxu1 %v1752_v26 }
  0xbf   :  { %1134 = vmatprep.subr.bf16.mxu1 %v1534_v0  ;;  %1115 = vmatmul.mubr.bf16.vlgmr.msra.gmra.mxu0 %v1536_v1 }
  0xc0   :  { %1127 = vmatpush3.bf16.msra.mxu0 %v1192_v16  ;;  %1130 = vmatprep.mubr.msk.bf16.mxu0 %vm1535_vm0, %v1534_v0 }
  0xc1   :  { %1123 = vmatmul.mubr.bf16.vlgmr.msra.gmra.mxu1 %v1536_v1  ;;  %1128 = vmatprep.subr.bf16.mxu0 %v1534_v0 }
  0xc2   :  { %1135 = vmatpush3.bf16.msra.mxu1 %v1195_v22  ;;  %1138 = vmatprep.mubr.msk.bf16.mxu1 %vm1535_vm0, %v1534_v0 }
  0xc3   :  { %1136 = vmatprep.subr.bf16.mxu1 %v1534_v0 }
  0xc4   :  { %1129 = vmatpush3.bf16.msra.mxu0 %v1194_v20 }
  0xc5   :  { %1142 = vmatprep.subr.bf16.mxu0 %v1534_v0 }
  0xc6   :  { %1137 = vmatpush3.bf16.msra.mxu1 %v1196_v24 }
  0xc7   :  { %1150 = vmatprep.subr.bf16.mxu1 %v1534_v0 }
 0x12a   :  { %v683_v22 = vpop.permute.xlu0 %682 }
 0x12b   :  { %vm684_vm4 = vcmp.eq.s32.totalorder %v683_v22, 1 }
 0x16f   :  { %v319_v29 = vpop.f32.mrf.mxu0 }
 0x170   :  { %v385_v30 = vpop.f32.mrf.mxu1  ;;  %v320_v31 = vadd.f32 %v1006_v27, %v319_v29 }
 0x171   :  { %v386_v32 = vadd.f32 %v1010_v28, %v385_v30  ;;  %v1084_v33 = vpop.f32.mrf.mxu0  ;;  %v1201_v30 = vld [vmem:[#allocation25 + $0x8] sm:$0xff]  }
 0x172   :  { %v1092_v34 = vpop.f32.mrf.mxu1  ;;  %326 = vst.msk [vmem:[#allocation2] sm:$0xff] %vm281_vm1, %v320_v31  ;;  %v233_v31 = vld [vmem:[#allocation5] sm:$0xff]  ;;  %v1202_v33 = vld [vmem:[#allocation25] sm:$0xff]  }
 0x173   :  { %392 = vst.msk [vmem:[#allocation3] sm:$0xff] %vm281_vm1, %v386_v32  ;;  %v322_v35 = vpop.f32.mrf.mxu0  ;;  %v1200_v32 = vld [vmem:[%s1852_s17] sm:$0xff]   ;;  %978 = vrot.lane.b32.xlu1 %v233_v31, %s1537_s25 }
 0x174   :  { %v388_v36 = vpop.f32.mrf.mxu1  ;;  %v323_v37 = vadd.f32 %v1006_v27, %v322_v35 }
 0x175   :  { %v389_v38 = vadd.f32 %v1010_v28, %v388_v36  ;;  %v1085_v39 = vpop.f32.mrf.mxu0 }
 0x176   :  { %v1093_v40 = vpop.f32.mrf.mxu1  ;;  %327 = vst.msk [vmem:[#allocation2 + $0x8] sm:$0xff] %vm281_vm1, %v323_v37 }
 0x177   :  { %393 = vst.msk [vmem:[#allocation3 + $0x8] sm:$0xff] %vm281_vm1, %v389_v38  ;;  %v451_v42 = vpop.f32.mrf.mxu0 }
 0x178   :  { %v528_v43 = vpop.f32.mrf.mxu1  ;;  %v452_v44 = vadd.f32 %v1014_v41, %v451_v42 }
 0x179   :  { %v476_v46 = vld [vmem:[#allocation2] sm:$0xff]  ;;  %v1100_v47 = vpop.f32.mrf.mxu0 }
 0x17a   :  { %v1108_v48 = vpop.f32.mrf.mxu1  ;;  %458 = vst.msk [vmem:[#allocation4] sm:$0xff] %vm281_vm1, %v452_v44  ;;  %v534_v49 = vadd.f32 %v528_v43, %v476_v46  ;;  %v477_v58 = vld [vmem:[#allocation3] sm:$0xff] }
 0x17b   :  { %v454_v50 = vpop.f32.mrf.mxu0 }
 0x17c   :  { %v531_v51 = vpop.f32.mrf.mxu1  ;;  %v541_v52 = vadd.f32 %v1777_v45, %v534_v49  ;;  %v455_v53 = vadd.f32 %v1014_v41, %v454_v50 }
 0x17d   :  { %v1101_v54 = vpop.f32.mrf.mxu0  ;;  %v687_v36 = vld [vmem:[#allocation2 + $0x8] sm:$0xff] }
 0x17e   :  { %v1109_v55 = vpop.f32.mrf.mxu1  ;;  %v1021_v56 = vmul.f32 -1.442695, %v541_v52  ;;  %459 = vst.msk [vmem:[#allocation4 + $0x8] sm:$0xff] %vm281_vm1, %v455_v53  ;;  %v689_v42 = vld [vmem:[#allocation3 + $0x8] sm:$0xff] }
 0x17f   :  { %v594_v59 = vpop.f32.mrf.mxu0 }
 0x180   :  { %1203 = vpow2.f32 %v1021_v56  ;;  %v600_v60 = vadd.f32 %v594_v59, %v477_v58 }
 0x181   :  { %v666_v61 = vpop.f32.mrf.mxu1  ;;  %v1116_v62 = vpop.f32.mrf.mxu0  ;;  %v478_v17 = vld [vmem:[#allocation4] sm:$0xff] }
 0x182   :  { %v607_v63 = vadd.f32 %v1785_v57, %v600_v60  ;;  %v667_v14 = vadd.f32 %v1791_v12, %v666_v61 }
 0x183   :  { %v1124_v1 = vpop.f32.mrf.mxu1  ;;  %v597_v2 = vpop.f32.mrf.mxu0 }
 0x184   :  { %v1025_v5 = vmul.f32 -1.442695, %v607_v63  ;;  %v843_v2 = vpop.permute.xlu0 %842 }
 0x185   :  { %v669_v3 = vpop.f32.mrf.mxu1  ;;  %v1117_v4 = vpop.f32.mrf.mxu0  ;;  %v691_v61 = vld [vmem:[#allocation4 + $0x8] sm:$0xff]  ;;  %vm844_vm5 = vcmp.eq.s32.totalorder %v843_v2, 1 }
 0x186   :  { %1205 = vpow2.f32 %v1025_v5 }
 0x187   :  { %v1125_v7 = vpop.f32.mrf.mxu1 }
 0x18d   :  { %v1204_v8 = vpop.eup %1203 }
 0x18e   :  { %v545_v9 = vadd.f32 1.0, %v1204_v8 }
 0x190   :  { %1207 = vrcp.f32 %v545_v9 }
 0x193   :  { %v1206_v11 = vpop.eup %1205 }
 0x194   :  { %v611_v13 = vadd.f32 1.0, %v1206_v11 }
 0x196   :  { %1209 = vrcp.f32 %v611_v13 }
 0x19d   :  { %v1208_v15 = vpop.eup %1207 }
 0x19e   :  { %v672_v16 = vmul.f32 %v1208_v15, %v667_v14  ;;  %v1040_v15 = vld [vmem:[%s1854_s19] ss:$0 sm:$0xff] }
 0x1a0   :  { %v673_v18 = vadd.f32 %v672_v16, %v478_v17 }
 0x1a2   :  { %1211 = vtanh.f32 %v673_v18 }
 0x1a3   :  { %v1210_v19 = vpop.eup %1209 }
 0x1a4   :  { %v675_v20 = vsub.f32 1.0, %v1210_v19  ;;  %v677_v25 = vmul.f32 0.0, %v1210_v19 }
 0x1af   :  { %v1212_v21 = vpop.eup %1211 }
 0x1b0   :  { %v676_v24 = vmul.f32 %v1212_v21, %v675_v20 }
 0x1b2   :  { %v678_v27 = vadd.f32 %v677_v25, %v676_v24 }
 0x1b4   :  { %v1794_v28 = vsel %vm684_vm4, %v678_v27, 0.0 }
 0x1b5   :  { %v692_v29 = vpack.c.bf16 %v1794_v28, %v1794_v28 }
 0x1b7   :  { %1131 = vmatmul.mubr.msk.bf16.vlgmr.msra.gmra.mxu0 %vm281_vm1, %v692_v29  ;;  %1139 = vmatmul.mubr.msk.bf16.vlgmr.msra.gmra.mxu1 %vm281_vm1, %v692_v29 }
 0x1b8   :  { %1143 = vmatpush3.bf16.msra.mxu0 %v1743_v23  ;;  %1146 = vmatprep.mubr.msk.bf16.mxu0 %vm1535_vm0, %v1534_v0  ;;  %v1199_v23 = vld [vmem:[%s1852_s17 + $0x8] sm:$0xff]  }
 0x1b9   :  { %1144 = vmatprep.subr.bf16.mxu0 %v1534_v0  ;;  %1154 = vmatprep.mubr.msk.bf16.mxu1 %vm1535_vm0, %v1534_v0 }
 0x1ba   :  { %1151 = vmatpush3.bf16.msra.mxu1 %v1201_v30 }
 0x1bb   :  { %1152 = vmatprep.subr.bf16.mxu1 %v1534_v0 }
 0x1bc   :  { %1145 = vmatpush3.bf16.msra.mxu0 %v1752_v26  ;;  %v240_v26 = vmul.f32 %v1719_v6, %v233_v31 }
 0x1bd   :  { %1158 = vmatprep.subr.bf16.mxu0 %v1534_v0 }
 0x1be   :  { %v247_v34 = vadd.f32 %v1721_v10, %v240_v26  ;;  %1153 = vmatpush3.bf16.msra.mxu1 %v1202_v33 }
 0x1bf   :  { %1147 = vmatmul.mubr.msk.bf16.vlgmr.msra.gmra.mxu0 %vm281_vm1, %v692_v29 }
 0x1c0   :  { %1162 = vmatprep.mubr.msk.bf16.mxu0 %vm1535_vm0, %v1534_v0  ;;  %1159 = vmatpush3.bf16.msra.mxu0 %v1199_v23  ;;  %v850_v35 = vpack.c.bf16 %v247_v34, %v247_v34 }
 0x1c1   :  { %1160 = vmatprep.subr.bf16.mxu0 %v1534_v0 }
 0x1c4   :  { %1161 = vmatpush3.bf16.msra.mxu0 %v1200_v32 }
 0x1c7   :  { %1163 = vmatmul.mubr.msk.bf16.vlgmr.msra.gmra.mxu0 %vm281_vm1, %v850_v35 }
 0x1e5   :  { %v979_v20 = vpop.permute.xlu1 %978 }
 0x277   :  { %v730_v37 = vpop.f32.mrf.mxu0  ;;  %v778_v38 = vpop.f32.mrf.mxu1 }
 0x278   :  { %v736_v39 = vadd.f32 %v730_v37, %v687_v36  ;;  %v784_v10 = vadd.f32 %v778_v38, %v689_v42 }
 0x279   :  { %v1132_v40 = vpop.f32.mrf.mxu0  ;;  %v1140_v6 = vpop.f32.mrf.mxu1 }
 0x27a   :  { %v737_v41 = vadd.f32 %v1777_v45, %v736_v39  ;;  %v785_v49 = vadd.f32 %v1785_v57, %v784_v10 }
 0x27b   :  { %v733_v43 = vpop.f32.mrf.mxu0  ;;  %v781_v0 = vpop.f32.mrf.mxu1 }
 0x27c   :  { %v1030_v44 = vmul.f32 -1.442695, %v737_v41  ;;  %v1032_v52 = vmul.f32 -1.442695, %v785_v49 }
 0x27d   :  { %v1133_v46 = vpop.f32.mrf.mxu0  ;;  %v1141_v47 = vpop.f32.mrf.mxu1 }
 0x27e   :  { %1213 = vpow2.f32 %v1030_v44 }
 0x27f   :  { %v826_v48 = vpop.f32.mrf.mxu0  ;;  %1215 = vpow2.f32 %v1032_v52 }
 0x280   :  { %v827_v58 = vadd.f32 %v1791_v12, %v826_v48 }
 0x281   :  { %v1148_v50 = vpop.f32.mrf.mxu0 }
 0x283   :  { %v829_v51 = vpop.f32.mrf.mxu0 }
 0x285   :  { %v1149_v53 = vpop.f32.mrf.mxu0 }
 0x287   :  { %v960_v9 = vpop.f32.mrf.mxu0 }
 0x289   :  { %v1164_v11 = vpop.f32.mrf.mxu0 }
 0x28b   :  { %v1214_v54 = vpop.eup %1213  ;;  %v963_v12 = vpop.f32.mrf.mxu0 }
 0x28c   :  { %v741_v55 = vadd.f32 1.0, %v1214_v54  ;;  %v1216_v45 = vpop.eup %1215 }
 0x28d   :  { %v789_v56 = vadd.f32 1.0, %v1216_v45  ;;  %v1165_v13 = vpop.f32.mrf.mxu0 }
 0x28e   :  { %1217 = vrcp.f32 %v741_v55 }
 0x28f   :  { %1219 = vrcp.f32 %v789_v56 }
 0x29b   :  { %v1218_v59 = vpop.eup %1217 }
 0x29c   :  { %v832_v60 = vmul.f32 %v1218_v59, %v827_v58  ;;  %v1220_v63 = vpop.eup %1219 }
 0x29d   :  { %v835_v57 = vsub.f32 1.0, %v1220_v63  ;;  %v837_v4 = vmul.f32 %v1220_v63, %v1794_v28 }
 0x29e   :  { %v833_v62 = vadd.f32 %v832_v60, %v691_v61 }
 0x2a0   :  { %1221 = vtanh.f32 %v833_v62 }
 0x2ad   :  { %v1222_v1 = vpop.eup %1221 }
 0x2ae   :  { %v836_v3 = vmul.f32 %v1222_v1, %v835_v57 }
 0x2b0   :  { %v838_v5 = vadd.f32 %v837_v4, %v836_v3 }
 0x2b2   :  { %v845_v7 = vsel %vm844_vm5, %v838_v5, %v1794_v28 }
 0x2b3   :  { %v855_v8 = vpack.c.bf16 %v845_v7, %v845_v7 }
 0x2b5   :  { %1155 = vmatmul.mubr.msk.bf16.vlgmr.msra.gmra.mxu1 %vm281_vm1, %v855_v8 }
 0x375   :  { %v905_v14 = vpop.f32.mrf.mxu1 }
 0x376   :  { %v961_v16 = vadd.f32 %v960_v9, %v905_v14 }
 0x377   :  { %v1156_v17 = vpop.f32.mrf.mxu1 }
 0x378   :  { %vm967_vm6 = vcmp.ge.f32.partialorder %v961_v16, 0.0  ;;  %v974_v18 = vmul.f32 %v1040_v15, %v961_v16 }
 0x379   :  { %v908_v19 = vpop.f32.mrf.mxu1 }
 0x37a   :  { %v975_v21 = vsel %vm967_vm6, %v961_v16, %v974_v18 }
 0x37b   :  { %976 = vst.msk [vmem:[#allocation26] sm:$0xff] %vm281_vm1, %v975_v21  ;;  %v1157_v22 = vpop.f32.mrf.mxu1 }
 0x37c   :  { %982 = vst.msk [vmem:[#allocation26] sm:$0xff] %vm981_vm7, %v979_v20 }
 0x37d   :  { %1494 = shalt.err (!%p1491_p13)
}
 0x37e   :  { %992 = dma.vmem_to_hbm [thread:$0]  %s990_s8, 128, %s1855_s20, [#allocation7]  }
 0x37f   :  { %1517 = dma.done.wait [#allocation7], 128  }
 0x380   :  { %1518 = vsyncadd [#allocation7], 4294967168 }
 0x381   :  { %996 = vsyncpa [#allocation6], 1 }
 0x382   :  { %997 = vsyncpa [#allocation9], 1 }
 0x383   :  { %998 = vsyncpa [#allocation12], 1 }
 0x384   :  { %999 = vsyncpa [#allocation15], 1 }
 0x385   :  { %1000 = vsyncpa [#allocation18], 1 }
 0x386   :  { %1001 = vsyncpa [#allocation21], 1 }
 0x387   :  { %1002 = vsyncpa [#allocation24], 1 }
 0x388   :  { %1003 = vsyncpa [#allocation7], 1 }

</bundles_post_ra>
